<compile_context>
chip_gen: v7x
topology: tpu7x:2x2x1
jax: 0.10.0
libtpu: 0.0.40
codegen_flags: <defaults>
</compile_context>

<pallas_src>
import functools

import jax
import jax.numpy as jnp
from jax import lax
from jax.experimental import pallas as pl
from jax.experimental.pallas import tpu as pltpu

LN_EPS = 1e-5
N_KMEANS_ITERS = 10


def _dynamic_clustering_kernel(x_ref, g_ref, b_ref, centers_ref, soft_ref,
                               *, n_clusters, n_iters):
    K = n_clusters
    Bb, N, D = x_ref.shape

    # ---- LayerNorm over last dim (d_model) on a (Bb*N, D) slab, in f32 ----
    x = x_ref[...].reshape(Bb * N, D).astype(jnp.float32)
    mean = jnp.mean(x, axis=-1, keepdims=True)
    xc = x - mean
    var = jnp.mean(xc * xc, axis=-1, keepdims=True)
    xn = xc * lax.rsqrt(var + LN_EPS)
    xn = xn * g_ref[...] + b_ref[...]                 # gamma/beta broadcast (1, D)

    xn_b = xn.reshape(Bb, N, D)                       # f32 (init / exactness)
    xn_bf = xn_b.astype(jnp.bfloat16)                 # bf16 copy for MXU work

    # ---- deterministic init: first K normalized patches of each batch elem ----
    c0 = xn_b[:, :K, :]                               # (Bb, K, D) f32

    def lloyd_step(_, c):
        c_bf = c.astype(jnp.bfloat16)
        # Distances up to a per-point constant: ||x||^2 is constant along K, so
        # it cancels in the argmin (and later in the softmax) -- never compute it.
        cx = jnp.einsum('bkd,bnd->bkn', c_bf, xn_bf,
                        preferred_element_type=jnp.float32)    # (Bb, K, N)
        c2 = jnp.sum(c * c, axis=-1, keepdims=True)            # (Bb, K, 1) f32
        dist = c2 - 2.0 * cx                                   # (Bb, K, N)
        iota_k = lax.broadcasted_iota(jnp.int32, dist.shape, 1)
        min_d = jnp.min(dist, axis=1, keepdims=True)           # (Bb, 1, N)
        # first-occurrence argmin over K without lax.argmin
        idx = jnp.where(dist <= min_d, iota_k, K)
        label = jnp.min(idx, axis=1, keepdims=True)            # (Bb, 1, N)
        one_hot = (iota_k == label).astype(jnp.bfloat16)       # exact 0/1 in bf16
        sums = jnp.einsum('bkn,bnd->bkd', one_hot, xn_bf,
                          preferred_element_type=jnp.float32)  # (Bb, K, D)
        counts = jnp.sum(one_hot.astype(jnp.float32),
                         axis=-1, keepdims=True)               # (Bb, K, 1), exact
        inv_counts = pl.reciprocal(jnp.maximum(counts, 1.0), approx=True)  # EUP slot
        return jnp.where(counts > 0.0, sums * inv_counts, c)

    # Fixed short trip count -> fully unroll for LLO scheduler visibility.
    c = lax.fori_loop(0, n_iters, lloyd_step, c0, unroll=True)

    # ---- soft assignments: softmax(-||x - c||^2) over clusters ----
    # Computed directly in the (Bb, N, K) output orientation so the result is
    # stored straight into the module's (B, N, K) layout -- no transpose in the
    # kernel or the wrapper. ||x||^2 again cancels in the softmax over K.
    c_bf = c.astype(jnp.bfloat16)
    cx_nk = jnp.einsum('bnd,bkd->bnk', xn_bf, c_bf,
                       preferred_element_type=jnp.float32)     # (Bb, N, K)
    c2_nk = jnp.sum(c * c, axis=-1)[:, None, :]                # (Bb, 1, K)
    logits = 2.0 * cx_nk - c2_nk
    m = jnp.max(logits, axis=-1, keepdims=True)
    e = jnp.exp(logits - m)
    denom = jnp.sum(e, axis=-1, keepdims=True)
    soft = e / denom                                           # exact: rows sum to 1

    centers_ref[...] = c.astype(centers_ref.dtype)
    soft_ref[...] = soft.astype(soft_ref.dtype)


def _block_vmem_bytes(bb, N, D, K, in_itemsize):
    """Rough per-block VMEM working-set estimate (bytes)."""
    io = 2 * bb * N * D * in_itemsize        # double-buffered input window
    io += 2 * bb * K * D * 4                 # double-buffered centers output
    io += 2 * bb * N * K * 4                 # double-buffered soft output
    work = bb * N * D * (4 + 2)              # xn_b in f32 + bf16
    work += 6 * bb * K * N * 4               # live (K, N) f32 arrays in the Lloyd step
    work += 4 * bb * N * K * 4               # final (N, K) logits / exp / soft temps
    work += 4 * bb * K * D * 4               # centroid copies (old/new, f32 + bf16)
    return int(1.5 * (io + work))            # headroom for compiler temporaries


def _pick_block_b(B, N, D, K, in_itemsize, budget_bytes):
    # Largest divisor of B whose per-block working set fits the VMEM budget,
    # capped at B//2 so the batch grid has >= 2 steps (keeps both v7x
    # TensorCores busy via the "parallel" dimension semantics).
    cap = max(1, B // 2)
    best = 1
    for bb in range(1, cap + 1):
        if B % bb == 0 and _block_vmem_bytes(bb, N, D, K, in_itemsize) <= budget_bytes:
            best = bb
    return best


def dynamic_clustering(patches, gamma, beta, *, n_clusters,
                       n_iters=N_KMEANS_ITERS, block_b=None):
    """patches: (B, N, D); gamma/beta: (D,) LayerNorm params."""
    B, N, D = patches.shape
    K = n_clusters
    assert N >= K, "first-K-points k-means init requires N >= n_clusters"

    # Per-generation VMEM budget: 128 MiB on v5e/v6e, 64 MiB per TC on v7x.
    try:
        vmem_cap = int(pltpu.get_tpu_info().vmem_capacity_bytes)
    except Exception:
        vmem_cap = 64 * 1024 * 1024          # conservative fallback (v7x per-TC)

    in_itemsize = jnp.dtype(patches.dtype).itemsize
    if block_b is None:
        block_b = _pick_block_b(B, N, D, K, in_itemsize,
                                budget_bytes=vmem_cap // 3)
    assert B % block_b == 0

    need = _block_vmem_bytes(block_b, N, D, K, in_itemsize)
    # Bump past v5e's 16 MiB scoped default; never exceed 3/4 of physical VMEM.
    vmem_limit = int(min(vmem_cap * 3 // 4, max(32 * 1024 * 1024, 2 * need)))

    gamma2 = gamma.reshape(1, D).astype(jnp.float32)
    beta2 = beta.reshape(1, D).astype(jnp.float32)

    kernel = functools.partial(_dynamic_clustering_kernel,
                               n_clusters=K, n_iters=n_iters)

    centers, soft = pl.pallas_call(
        kernel,
        out_shape=(
            jax.ShapeDtypeStruct((B, K, D), jnp.float32),
            jax.ShapeDtypeStruct((B, N, K), jnp.float32),
        ),
        grid_spec=pltpu.PrefetchScalarGridSpec(
            num_scalar_prefetch=0,
            grid=(B // block_b,),
            in_specs=[
                pl.BlockSpec((block_b, N, D), lambda b: (b, 0, 0)),  # patches (native dtype)
                pl.BlockSpec((1, D), lambda b: (0, 0)),              # gamma
                pl.BlockSpec((1, D), lambda b: (0, 0)),              # beta
            ],
            out_specs=[
                pl.BlockSpec((block_b, K, D), lambda b: (b, 0, 0)),  # centers
                pl.BlockSpec((block_b, N, K), lambda b: (b, 0, 0)),  # soft (N, K)
            ],
        ),
        compiler_params=pltpu.CompilerParams(
            # Batch axis is embarrassingly parallel -> shards across TCs on v7x
            # (grid always has >= 2 steps when B >= 2); no-op on v5e/v6e.
            dimension_semantics=("parallel",),
            vmem_limit_bytes=vmem_limit),
    )(patches, gamma2, beta2)

    return centers, soft


if __name__ == "__main__":
    # Small shapes consistent with the module: batch=2, 16 patches, d_model=32,
    # 4 clusters.
    B, N, D, K = 2, 16, 32, 4

    key = jax.random.PRNGKey(0)
    patches = jax.random.normal(key, (B, N, D), dtype=jnp.float32)

    # nn.LayerNorm(d_model) default init: weight=1, bias=0 (deterministic).
    gamma = jnp.ones((D,), dtype=jnp.float32)
    beta = jnp.zeros((D,), dtype=jnp.float32)

    centers, soft = dynamic_clustering(patches, gamma, beta, n_clusters=K)
    jax.block_until_ready((centers, soft))

    assert centers.shape == (B, K, D)
    assert soft.shape == (B, N, K)
    assert bool(jnp.all(jnp.isfinite(centers)))
    assert bool(jnp.all(jnp.isfinite(soft)))
    # soft assignments are a proper distribution over clusters (exact divide).
    assert bool(jnp.allclose(jnp.sum(soft, axis=-1), 1.0, atol=1e-4))

    print("KERNEL_OK")
</pallas_src>

<mosaic_0001>
module attributes {stable_mosaic.version = 11 : i64} {
  func.func @_dynamic_clustering_kernel(%arg0: i32, %arg1: memref<1x16x32xf32, #tpu.memory_space<vmem>>, %arg2: memref<1x32xf32, #tpu.memory_space<vmem>>, %arg3: memref<1x32xf32, #tpu.memory_space<vmem>>, %arg4: memref<1x4x32xf32, #tpu.memory_space<vmem>>, %arg5: memref<1x16x4xf32, #tpu.memory_space<vmem>>) attributes {dimension_semantics = [#tpu.dimension_semantics<parallel>], iteration_bounds = array<i64: 2>, scalar_prefetch = 0 : i64, scratch_operands = 0 : i64, tpu.core_type = #tpu.core_type<tc>, window_params = [{transform_indices = @transform_0, window_bounds = array<i64: 1, 16, 32>}, {pipeline_mode = #tpu.pipeline_mode<synchronous>, transform_indices = @transform_1, window_bounds = array<i64: 1, 32>}, {pipeline_mode = #tpu.pipeline_mode<synchronous>, transform_indices = @transform_2, window_bounds = array<i64: 1, 32>}, {transform_indices = @transform_3, window_bounds = array<i64: 1, 4, 32>}, {transform_indices = @transform_4, window_bounds = array<i64: 1, 16, 4>}]} {
    %c0 = arith.constant 0 : index
    %c0_0 = arith.constant 0 : index
    %c0_1 = arith.constant 0 : index
    %0 = vector.load %arg1[%c0, %c0_0, %c0_1] : memref<1x16x32xf32, #tpu.memory_space<vmem>>, vector<1x16x32xf32>
    %1 = vector.shape_cast %0 : vector<1x16x32xf32> to vector<16x32xf32>
    %cst = arith.constant dense<0.000000e+00> : vector<16xf32>
    %2 = vector.multi_reduction <add>, %1, %cst [1] : vector<16x32xf32> to vector<16xf32>
    %3 = vector.shape_cast %2 : vector<16xf32> to vector<16x1xf32>
    %cst_2 = arith.constant 3.200000e+01 : f32
    %4 = vector.broadcast %cst_2 : f32 to vector<16x1xf32>
    %5 = arith.divf %3, %4 : vector<16x1xf32>
    %6 = vector.broadcast %5 : vector<16x1xf32> to vector<16x32xf32>
    %7 = arith.subf %1, %6 : vector<16x32xf32>
    %8 = arith.mulf %7, %7 : vector<16x32xf32>
    %cst_3 = arith.constant dense<0.000000e+00> : vector<16xf32>
    %9 = vector.multi_reduction <add>, %8, %cst_3 [1] : vector<16x32xf32> to vector<16xf32>
    %10 = vector.shape_cast %9 : vector<16xf32> to vector<16x1xf32>
    %cst_4 = arith.constant 3.200000e+01 : f32
    %11 = vector.broadcast %cst_4 : f32 to vector<16x1xf32>
    %12 = arith.divf %10, %11 : vector<16x1xf32>
    %cst_5 = arith.constant 9.99999974E-6 : f32
    %13 = vector.broadcast %cst_5 : f32 to vector<16x1xf32>
    %14 = arith.addf %12, %13 : vector<16x1xf32>
    %15 = math.rsqrt %14 : vector<16x1xf32>
    %16 = vector.broadcast %15 : vector<16x1xf32> to vector<16x32xf32>
    %17 = arith.mulf %7, %16 : vector<16x32xf32>
    %c0_6 = arith.constant 0 : index
    %c0_7 = arith.constant 0 : index
    %18 = vector.load %arg2[%c0_6, %c0_7] : memref<1x32xf32, #tpu.memory_space<vmem>>, vector<1x32xf32>
    %19 = vector.broadcast %18 : vector<1x32xf32> to vector<16x32xf32>
    %20 = arith.mulf %17, %19 : vector<16x32xf32>
    %c0_8 = arith.constant 0 : index
    %c0_9 = arith.constant 0 : index
    %21 = vector.load %arg3[%c0_8, %c0_9] : memref<1x32xf32, #tpu.memory_space<vmem>>, vector<1x32xf32>
    %22 = vector.broadcast %21 : vector<1x32xf32> to vector<16x32xf32>
    %23 = arith.addf %20, %22 : vector<16x32xf32>
    %24 = vector.shape_cast %23 : vector<16x32xf32> to vector<1x16x32xf32>
    %25 = arith.truncf %24 : vector<1x16x32xf32> to vector<1x16x32xbf16>
    %26 = vector.extract_strided_slice %24 {offsets = [0, 0, 0], sizes = [1, 4, 32], strides = [1, 1, 1]} : vector<1x16x32xf32> to vector<1x4x32xf32>
    %c0_i32 = arith.constant 0 : i32
    %27 = arith.truncf %26 : vector<1x4x32xf32> to vector<1x4x32xbf16>
    "tpu.trace_start"() <{level = 10 : i32, message = "bkd,bnd->bkn"}> : () -> ()
    %cst_10 = arith.constant dense<0.000000e+00> : vector<1x4x16xf32>
    %28 = tpu.matmul %27, %25, %cst_10 {dimension_numbers = #tpu.dot_dimension_numbers<[2], [2], [1], [1], [0, 0, 0, 1, 1, 1], [0], [0]>} : vector<1x4x32xbf16>, vector<1x16x32xbf16>, vector<1x4x16xf32> -> vector<1x4x16xf32>
    "tpu.trace_stop"() : () -> ()
    %29 = arith.mulf %26, %26 : vector<1x4x32xf32>
    %cst_11 = arith.constant dense<0.000000e+00> : vector<1x4xf32>
    %30 = vector.multi_reduction <add>, %29, %cst_11 [2] : vector<1x4x32xf32> to vector<1x4xf32>
    %31 = vector.shape_cast %30 : vector<1x4xf32> to vector<1x4x1xf32>
    %cst_12 = arith.constant 2.000000e+00 : f32
    %32 = vector.broadcast %cst_12 : f32 to vector<1x4x16xf32>
    %33 = arith.mulf %32, %28 : vector<1x4x16xf32>
    %34 = vector.broadcast %31 : vector<1x4x1xf32> to vector<1x4x16xf32>
    %35 = arith.subf %34, %33 : vector<1x4x16xf32>
    %36 = tpu.iota {dimensions = array<i32: 1>} : vector<1x4x16xi32>
    %cst_13 = arith.constant dense<0x7F800000> : vector<1x16xf32>
    %37 = vector.multi_reduction <minimumf>, %35, %cst_13 [1] : vector<1x4x16xf32> to vector<1x16xf32>
    %38 = vector.shape_cast %37 : vector<1x16xf32> to vector<1x1x16xf32>
    %39 = vector.broadcast %38 : vector<1x1x16xf32> to vector<1x4x16xf32>
    %40 = arith.cmpf ole, %35, %39 : vector<1x4x16xf32>
    %c4_i32 = arith.constant 4 : i32
    %41 = vector.broadcast %c4_i32 : i32 to vector<1x4x16xi32>
    %42 = arith.select %40, %36, %41 : vector<1x4x16xi1>, vector<1x4x16xi32>
    %cst_14 = arith.constant dense<2147483647> : vector<1x16xi32>
    %43 = vector.multi_reduction <minsi>, %42, %cst_14 [1] : vector<1x4x16xi32> to vector<1x16xi32>
    %44 = vector.shape_cast %43 : vector<1x16xi32> to vector<1x1x16xi32>
    %45 = vector.broadcast %44 : vector<1x1x16xi32> to vector<1x4x16xi32>
    %46 = arith.cmpi eq, %36, %45 : vector<1x4x16xi32>
    %47 = arith.extui %46 : vector<1x4x16xi1> to vector<1x4x16xi32>
    %48 = arith.sitofp %47 : vector<1x4x16xi32> to vector<1x4x16xf32>
    %49 = arith.truncf %48 : vector<1x4x16xf32> to vector<1x4x16xbf16>
    "tpu.trace_start"() <{level = 10 : i32, message = "bkn,bnd->bkd"}> : () -> ()
    %cst_15 = arith.constant dense<0.000000e+00> : vector<1x4x32xf32>
    %50 = tpu.matmul %49, %25, %cst_15 {dimension_numbers = #tpu.dot_dimension_numbers<[2], [1], [1], [2], [0, 0, 0, 1, 1, 2], [0], [0]>} : vector<1x4x16xbf16>, vector<1x16x32xbf16>, vector<1x4x32xf32> -> vector<1x4x32xf32>
    "tpu.trace_stop"() : () -> ()
    %51 = arith.extf %49 : vector<1x4x16xbf16> to vector<1x4x16xf32>
    %cst_16 = arith.constant dense<0.000000e+00> : vector<1x4xf32>
    %52 = vector.multi_reduction <add>, %51, %cst_16 [2] : vector<1x4x16xf32> to vector<1x4xf32>
    %53 = vector.shape_cast %52 : vector<1x4xf32> to vector<1x4x1xf32>
    %cst_17 = arith.constant 1.000000e+00 : f32
    %54 = vector.broadcast %cst_17 : f32 to vector<1x4x1xf32>
    %55 = arith.maximumf %53, %54 : vector<1x4x1xf32>
    %56 = tpu.reciprocal %55 {approx = true} : vector<1x4x1xf32> -> vector<1x4x1xf32>
    %cst_18 = arith.constant 0.000000e+00 : f32
    %57 = vector.broadcast %cst_18 : f32 to vector<1x4x1xf32>
    %58 = arith.cmpf ogt, %53, %57 : vector<1x4x1xf32>
    %59 = vector.broadcast %56 : vector<1x4x1xf32> to vector<1x4x32xf32>
    %60 = arith.mulf %50, %59 : vector<1x4x32xf32>
    %61 = vector.shape_cast %58 : vector<1x4x1xi1> to vector<1x4x1xi1>
    %62 = vector.broadcast %61 : vector<1x4x1xi1> to vector<1x4x32xi1>
    %63 = arith.select %62, %60, %26 : vector<1x4x32xi1>, vector<1x4x32xf32>
    %c1_i32 = arith.constant 1 : i32
    %64 = arith.truncf %63 : vector<1x4x32xf32> to vector<1x4x32xbf16>
    "tpu.trace_start"() <{level = 10 : i32, message = "bkd,bnd->bkn"}> : () -> ()
    %cst_19 = arith.constant dense<0.000000e+00> : vector<1x4x16xf32>
    %65 = tpu.matmul %64, %25, %cst_19 {dimension_numbers = #tpu.dot_dimension_numbers<[2], [2], [1], [1], [0, 0, 0, 1, 1, 1], [0], [0]>} : vector<1x4x32xbf16>, vector<1x16x32xbf16>, vector<1x4x16xf32> -> vector<1x4x16xf32>
    "tpu.trace_stop"() : () -> ()
    %66 = arith.mulf %63, %63 : vector<1x4x32xf32>
    %cst_20 = arith.constant dense<0.000000e+00> : vector<1x4xf32>
    %67 = vector.multi_reduction <add>, %66, %cst_20 [2] : vector<1x4x32xf32> to vector<1x4xf32>
    %68 = vector.shape_cast %67 : vector<1x4xf32> to vector<1x4x1xf32>
    %cst_21 = arith.constant 2.000000e+00 : f32
    %69 = vector.broadcast %cst_21 : f32 to vector<1x4x16xf32>
    %70 = arith.mulf %69, %65 : vector<1x4x16xf32>
    %71 = vector.broadcast %68 : vector<1x4x1xf32> to vector<1x4x16xf32>
    %72 = arith.subf %71, %70 : vector<1x4x16xf32>
    %73 = tpu.iota {dimensions = array<i32: 1>} : vector<1x4x16xi32>
    %cst_22 = arith.constant dense<0x7F800000> : vector<1x16xf32>
    %74 = vector.multi_reduction <minimumf>, %72, %cst_22 [1] : vector<1x4x16xf32> to vector<1x16xf32>
    %75 = vector.shape_cast %74 : vector<1x16xf32> to vector<1x1x16xf32>
    %76 = vector.broadcast %75 : vector<1x1x16xf32> to vector<1x4x16xf32>
    %77 = arith.cmpf ole, %72, %76 : vector<1x4x16xf32>
    %c4_i32_23 = arith.constant 4 : i32
    %78 = vector.broadcast %c4_i32_23 : i32 to vector<1x4x16xi32>
    %79 = arith.select %77, %73, %78 : vector<1x4x16xi1>, vector<1x4x16xi32>
    %cst_24 = arith.constant dense<2147483647> : vector<1x16xi32>
    %80 = vector.multi_reduction <minsi>, %79, %cst_24 [1] : vector<1x4x16xi32> to vector<1x16xi32>
    %81 = vector.shape_cast %80 : vector<1x16xi32> to vector<1x1x16xi32>
    %82 = vector.broadcast %81 : vector<1x1x16xi32> to vector<1x4x16xi32>
    %83 = arith.cmpi eq, %73, %82 : vector<1x4x16xi32>
    %84 = arith.extui %83 : vector<1x4x16xi1> to vector<1x4x16xi32>
    %85 = arith.sitofp %84 : vector<1x4x16xi32> to vector<1x4x16xf32>
    %86 = arith.truncf %85 : vector<1x4x16xf32> to vector<1x4x16xbf16>
    "tpu.trace_start"() <{level = 10 : i32, message = "bkn,bnd->bkd"}> : () -> ()
    %cst_25 = arith.constant dense<0.000000e+00> : vector<1x4x32xf32>
    %87 = tpu.matmul %86, %25, %cst_25 {dimension_numbers = #tpu.dot_dimension_numbers<[2], [1], [1], [2], [0, 0, 0, 1, 1, 2], [0], [0]>} : vector<1x4x16xbf16>, vector<1x16x32xbf16>, vector<1x4x32xf32> -> vector<1x4x32xf32>
    "tpu.trace_stop"() : () -> ()
    %88 = arith.extf %86 : vector<1x4x16xbf16> to vector<1x4x16xf32>
    %cst_26 = arith.constant dense<0.000000e+00> : vector<1x4xf32>
    %89 = vector.multi_reduction <add>, %88, %cst_26 [2] : vector<1x4x16xf32> to vector<1x4xf32>
    %90 = vector.shape_cast %89 : vector<1x4xf32> to vector<1x4x1xf32>
    %cst_27 = arith.constant 1.000000e+00 : f32
    %91 = vector.broadcast %cst_27 : f32 to vector<1x4x1xf32>
    %92 = arith.maximumf %90, %91 : vector<1x4x1xf32>
    %93 = tpu.reciprocal %92 {approx = true} : vector<1x4x1xf32> -> vector<1x4x1xf32>
    %cst_28 = arith.constant 0.000000e+00 : f32
    %94 = vector.broadcast %cst_28 : f32 to vector<1x4x1xf32>
    %95 = arith.cmpf ogt, %90, %94 : vector<1x4x1xf32>
    %96 = vector.broadcast %93 : vector<1x4x1xf32> to vector<1x4x32xf32>
    %97 = arith.mulf %87, %96 : vector<1x4x32xf32>
    %98 = vector.shape_cast %95 : vector<1x4x1xi1> to vector<1x4x1xi1>
    %99 = vector.broadcast %98 : vector<1x4x1xi1> to vector<1x4x32xi1>
    %100 = arith.select %99, %97, %63 : vector<1x4x32xi1>, vector<1x4x32xf32>
    %c2_i32 = arith.constant 2 : i32
    %101 = arith.truncf %100 : vector<1x4x32xf32> to vector<1x4x32xbf16>
    "tpu.trace_start"() <{level = 10 : i32, message = "bkd,bnd->bkn"}> : () -> ()
    %cst_29 = arith.constant dense<0.000000e+00> : vector<1x4x16xf32>
    %102 = tpu.matmul %101, %25, %cst_29 {dimension_numbers = #tpu.dot_dimension_numbers<[2], [2], [1], [1], [0, 0, 0, 1, 1, 1], [0], [0]>} : vector<1x4x32xbf16>, vector<1x16x32xbf16>, vector<1x4x16xf32> -> vector<1x4x16xf32>
    "tpu.trace_stop"() : () -> ()
    %103 = arith.mulf %100, %100 : vector<1x4x32xf32>
    %cst_30 = arith.constant dense<0.000000e+00> : vector<1x4xf32>
    %104 = vector.multi_reduction <add>, %103, %cst_30 [2] : vector<1x4x32xf32> to vector<1x4xf32>
    %105 = vector.shape_cast %104 : vector<1x4xf32> to vector<1x4x1xf32>
    %cst_31 = arith.constant 2.000000e+00 : f32
    %106 = vector.broadcast %cst_31 : f32 to vector<1x4x16xf32>
    %107 = arith.mulf %106, %102 : vector<1x4x16xf32>
    %108 = vector.broadcast %105 : vector<1x4x1xf32> to vector<1x4x16xf32>
    %109 = arith.subf %108, %107 : vector<1x4x16xf32>
    %110 = tpu.iota {dimensions = array<i32: 1>} : vector<1x4x16xi32>
    %cst_32 = arith.constant dense<0x7F800000> : vector<1x16xf32>
    %111 = vector.multi_reduction <minimumf>, %109, %cst_32 [1] : vector<1x4x16xf32> to vector<1x16xf32>
    %112 = vector.shape_cast %111 : vector<1x16xf32> to vector<1x1x16xf32>
    %113 = vector.broadcast %112 : vector<1x1x16xf32> to vector<1x4x16xf32>
    %114 = arith.cmpf ole, %109, %113 : vector<1x4x16xf32>
    %c4_i32_33 = arith.constant 4 : i32
    %115 = vector.broadcast %c4_i32_33 : i32 to vector<1x4x16xi32>
    %116 = arith.select %114, %110, %115 : vector<1x4x16xi1>, vector<1x4x16xi32>
    %cst_34 = arith.constant dense<2147483647> : vector<1x16xi32>
    %117 = vector.multi_reduction <minsi>, %116, %cst_34 [1] : vector<1x4x16xi32> to vector<1x16xi32>
    %118 = vector.shape_cast %117 : vector<1x16xi32> to vector<1x1x16xi32>
    %119 = vector.broadcast %118 : vector<1x1x16xi32> to vector<1x4x16xi32>
    %120 = arith.cmpi eq, %110, %119 : vector<1x4x16xi32>
    %121 = arith.extui %120 : vector<1x4x16xi1> to vector<1x4x16xi32>
    %122 = arith.sitofp %121 : vector<1x4x16xi32> to vector<1x4x16xf32>
    %123 = arith.truncf %122 : vector<1x4x16xf32> to vector<1x4x16xbf16>
    "tpu.trace_start"() <{level = 10 : i32, message = "bkn,bnd->bkd"}> : () -> ()
    %cst_35 = arith.constant dense<0.000000e+00> : vector<1x4x32xf32>
    %124 = tpu.matmul %123, %25, %cst_35 {dimension_numbers = #tpu.dot_dimension_numbers<[2], [1], [1], [2], [0, 0, 0, 1, 1, 2], [0], [0]>} : vector<1x4x16xbf16>, vector<1x16x32xbf16>, vector<1x4x32xf32> -> vector<1x4x32xf32>
    "tpu.trace_stop"() : () -> ()
    %125 = arith.extf %123 : vector<1x4x16xbf16> to vector<1x4x16xf32>
    %cst_36 = arith.constant dense<0.000000e+00> : vector<1x4xf32>
    %126 = vector.multi_reduction <add>, %125, %cst_36 [2] : vector<1x4x16xf32> to vector<1x4xf32>
    %127 = vector.shape_cast %126 : vector<1x4xf32> to vector<1x4x1xf32>
    %cst_37 = arith.constant 1.000000e+00 : f32
    %128 = vector.broadcast %cst_37 : f32 to vector<1x4x1xf32>
    %129 = arith.maximumf %127, %128 : vector<1x4x1xf32>
    %130 = tpu.reciprocal %129 {approx = true} : vector<1x4x1xf32> -> vector<1x4x1xf32>
    %cst_38 = arith.constant 0.000000e+00 : f32
    %131 = vector.broadcast %cst_38 : f32 to vector<1x4x1xf32>
    %132 = arith.cmpf ogt, %127, %131 : vector<1x4x1xf32>
    %133 = vector.broadcast %130 : vector<1x4x1xf32> to vector<1x4x32xf32>
    %134 = arith.mulf %124, %133 : vector<1x4x32xf32>
    %135 = vector.shape_cast %132 : vector<1x4x1xi1> to vector<1x4x1xi1>
    %136 = vector.broadcast %135 : vector<1x4x1xi1> to vector<1x4x32xi1>
    %137 = arith.select %136, %134, %100 : vector<1x4x32xi1>, vector<1x4x32xf32>
    %c3_i32 = arith.constant 3 : i32
    %138 = arith.truncf %137 : vector<1x4x32xf32> to vector<1x4x32xbf16>
    "tpu.trace_start"() <{level = 10 : i32, message = "bkd,bnd->bkn"}> : () -> ()
    %cst_39 = arith.constant dense<0.000000e+00> : vector<1x4x16xf32>
    %139 = tpu.matmul %138, %25, %cst_39 {dimension_numbers = #tpu.dot_dimension_numbers<[2], [2], [1], [1], [0, 0, 0, 1, 1, 1], [0], [0]>} : vector<1x4x32xbf16>, vector<1x16x32xbf16>, vector<1x4x16xf32> -> vector<1x4x16xf32>
    "tpu.trace_stop"() : () -> ()
    %140 = arith.mulf %137, %137 : vector<1x4x32xf32>
    %cst_40 = arith.constant dense<0.000000e+00> : vector<1x4xf32>
    %141 = vector.multi_reduction <add>, %140, %cst_40 [2] : vector<1x4x32xf32> to vector<1x4xf32>
    %142 = vector.shape_cast %141 : vector<1x4xf32> to vector<1x4x1xf32>
    %cst_41 = arith.constant 2.000000e+00 : f32
    %143 = vector.broadcast %cst_41 : f32 to vector<1x4x16xf32>
    %144 = arith.mulf %143, %139 : vector<1x4x16xf32>
    %145 = vector.broadcast %142 : vector<1x4x1xf32> to vector<1x4x16xf32>
    %146 = arith.subf %145, %144 : vector<1x4x16xf32>
    %147 = tpu.iota {dimensions = array<i32: 1>} : vector<1x4x16xi32>
    %cst_42 = arith.constant dense<0x7F800000> : vector<1x16xf32>
    %148 = vector.multi_reduction <minimumf>, %146, %cst_42 [1] : vector<1x4x16xf32> to vector<1x16xf32>
    %149 = vector.shape_cast %148 : vector<1x16xf32> to vector<1x1x16xf32>
    %150 = vector.broadcast %149 : vector<1x1x16xf32> to vector<1x4x16xf32>
    %151 = arith.cmpf ole, %146, %150 : vector<1x4x16xf32>
    %c4_i32_43 = arith.constant 4 : i32
    %152 = vector.broadcast %c4_i32_43 : i32 to vector<1x4x16xi32>
    %153 = arith.select %151, %147, %152 : vector<1x4x16xi1>, vector<1x4x16xi32>
    %cst_44 = arith.constant dense<2147483647> : vector<1x16xi32>
    %154 = vector.multi_reduction <minsi>, %153, %cst_44 [1] : vector<1x4x16xi32> to vector<1x16xi32>
    %155 = vector.shape_cast %154 : vector<1x16xi32> to vector<1x1x16xi32>
    %156 = vector.broadcast %155 : vector<1x1x16xi32> to vector<1x4x16xi32>
    %157 = arith.cmpi eq, %147, %156 : vector<1x4x16xi32>
    %158 = arith.extui %157 : vector<1x4x16xi1> to vector<1x4x16xi32>
    %159 = arith.sitofp %158 : vector<1x4x16xi32> to vector<1x4x16xf32>
    %160 = arith.truncf %159 : vector<1x4x16xf32> to vector<1x4x16xbf16>
    "tpu.trace_start"() <{level = 10 : i32, message = "bkn,bnd->bkd"}> : () -> ()
    %cst_45 = arith.constant dense<0.000000e+00> : vector<1x4x32xf32>
    %161 = tpu.matmul %160, %25, %cst_45 {dimension_numbers = #tpu.dot_dimension_numbers<[2], [1], [1], [2], [0, 0, 0, 1, 1, 2], [0], [0]>} : vector<1x4x16xbf16>, vector<1x16x32xbf16>, vector<1x4x32xf32> -> vector<1x4x32xf32>
    "tpu.trace_stop"() : () -> ()
    %162 = arith.extf %160 : vector<1x4x16xbf16> to vector<1x4x16xf32>
    %cst_46 = arith.constant dense<0.000000e+00> : vector<1x4xf32>
    %163 = vector.multi_reduction <add>, %162, %cst_46 [2] : vector<1x4x16xf32> to vector<1x4xf32>
    %164 = vector.shape_cast %163 : vector<1x4xf32> to vector<1x4x1xf32>
    %cst_47 = arith.constant 1.000000e+00 : f32
    %165 = vector.broadcast %cst_47 : f32 to vector<1x4x1xf32>
    %166 = arith.maximumf %164, %165 : vector<1x4x1xf32>
    %167 = tpu.reciprocal %166 {approx = true} : vector<1x4x1xf32> -> vector<1x4x1xf32>
    %cst_48 = arith.constant 0.000000e+00 : f32
    %168 = vector.broadcast %cst_48 : f32 to vector<1x4x1xf32>
    %169 = arith.cmpf ogt, %164, %168 : vector<1x4x1xf32>
    %170 = vector.broadcast %167 : vector<1x4x1xf32> to vector<1x4x32xf32>
    %171 = arith.mulf %161, %170 : vector<1x4x32xf32>
    %172 = vector.shape_cast %169 : vector<1x4x1xi1> to vector<1x4x1xi1>
    %173 = vector.broadcast %172 : vector<1x4x1xi1> to vector<1x4x32xi1>
    %174 = arith.select %173, %171, %137 : vector<1x4x32xi1>, vector<1x4x32xf32>
    %c4_i32_49 = arith.constant 4 : i32
    %175 = arith.truncf %174 : vector<1x4x32xf32> to vector<1x4x32xbf16>
    "tpu.trace_start"() <{level = 10 : i32, message = "bkd,bnd->bkn"}> : () -> ()
    %cst_50 = arith.constant dense<0.000000e+00> : vector<1x4x16xf32>
    %176 = tpu.matmul %175, %25, %cst_50 {dimension_numbers = #tpu.dot_dimension_numbers<[2], [2], [1], [1], [0, 0, 0, 1, 1, 1], [0], [0]>} : vector<1x4x32xbf16>, vector<1x16x32xbf16>, vector<1x4x16xf32> -> vector<1x4x16xf32>
    "tpu.trace_stop"() : () -> ()
    %177 = arith.mulf %174, %174 : vector<1x4x32xf32>
    %cst_51 = arith.constant dense<0.000000e+00> : vector<1x4xf32>
    %178 = vector.multi_reduction <add>, %177, %cst_51 [2] : vector<1x4x32xf32> to vector<1x4xf32>
    %179 = vector.shape_cast %178 : vector<1x4xf32> to vector<1x4x1xf32>
    %cst_52 = arith.constant 2.000000e+00 : f32
    %180 = vector.broadcast %cst_52 : f32 to vector<1x4x16xf32>
    %181 = arith.mulf %180, %176 : vector<1x4x16xf32>
    %182 = vector.broadcast %179 : vector<1x4x1xf32> to vector<1x4x16xf32>
    %183 = arith.subf %182, %181 : vector<1x4x16xf32>
    %184 = tpu.iota {dimensions = array<i32: 1>} : vector<1x4x16xi32>
    %cst_53 = arith.constant dense<0x7F800000> : vector<1x16xf32>
    %185 = vector.multi_reduction <minimumf>, %183, %cst_53 [1] : vector<1x4x16xf32> to vector<1x16xf32>
    %186 = vector.shape_cast %185 : vector<1x16xf32> to vector<1x1x16xf32>
    %187 = vector.broadcast %186 : vector<1x1x16xf32> to vector<1x4x16xf32>
    %188 = arith.cmpf ole, %183, %187 : vector<1x4x16xf32>
    %c4_i32_54 = arith.constant 4 : i32
    %189 = vector.broadcast %c4_i32_54 : i32 to vector<1x4x16xi32>
    %190 = arith.select %188, %184, %189 : vector<1x4x16xi1>, vector<1x4x16xi32>
    %cst_55 = arith.constant dense<2147483647> : vector<1x16xi32>
    %191 = vector.multi_reduction <minsi>, %190, %cst_55 [1] : vector<1x4x16xi32> to vector<1x16xi32>
    %192 = vector.shape_cast %191 : vector<1x16xi32> to vector<1x1x16xi32>
    %193 = vector.broadcast %192 : vector<1x1x16xi32> to vector<1x4x16xi32>
    %194 = arith.cmpi eq, %184, %193 : vector<1x4x16xi32>
    %195 = arith.extui %194 : vector<1x4x16xi1> to vector<1x4x16xi32>
    %196 = arith.sitofp %195 : vector<1x4x16xi32> to vector<1x4x16xf32>
    %197 = arith.truncf %196 : vector<1x4x16xf32> to vector<1x4x16xbf16>
    "tpu.trace_start"() <{level = 10 : i32, message = "bkn,bnd->bkd"}> : () -> ()
    %cst_56 = arith.constant dense<0.000000e+00> : vector<1x4x32xf32>
    %198 = tpu.matmul %197, %25, %cst_56 {dimension_numbers = #tpu.dot_dimension_numbers<[2], [1], [1], [2], [0, 0, 0, 1, 1, 2], [0], [0]>} : vector<1x4x16xbf16>, vector<1x16x32xbf16>, vector<1x4x32xf32> -> vector<1x4x32xf32>
    "tpu.trace_stop"() : () -> ()
    %199 = arith.extf %197 : vector<1x4x16xbf16> to vector<1x4x16xf32>
    %cst_57 = arith.constant dense<0.000000e+00> : vector<1x4xf32>
    %200 = vector.multi_reduction <add>, %199, %cst_57 [2] : vector<1x4x16xf32> to vector<1x4xf32>
    %201 = vector.shape_cast %200 : vector<1x4xf32> to vector<1x4x1xf32>
    %cst_58 = arith.constant 1.000000e+00 : f32
    %202 = vector.broadcast %cst_58 : f32 to vector<1x4x1xf32>
    %203 = arith.maximumf %201, %202 : vector<1x4x1xf32>
    %204 = tpu.reciprocal %203 {approx = true} : vector<1x4x1xf32> -> vector<1x4x1xf32>
    %cst_59 = arith.constant 0.000000e+00 : f32
    %205 = vector.broadcast %cst_59 : f32 to vector<1x4x1xf32>
    %206 = arith.cmpf ogt, %201, %205 : vector<1x4x1xf32>
    %207 = vector.broadcast %204 : vector<1x4x1xf32> to vector<1x4x32xf32>
    %208 = arith.mulf %198, %207 : vector<1x4x32xf32>
    %209 = vector.shape_cast %206 : vector<1x4x1xi1> to vector<1x4x1xi1>
    %210 = vector.broadcast %209 : vector<1x4x1xi1> to vector<1x4x32xi1>
    %211 = arith.select %210, %208, %174 : vector<1x4x32xi1>, vector<1x4x32xf32>
    %c5_i32 = arith.constant 5 : i32
    %212 = arith.truncf %211 : vector<1x4x32xf32> to vector<1x4x32xbf16>
    "tpu.trace_start"() <{level = 10 : i32, message = "bkd,bnd->bkn"}> : () -> ()
    %cst_60 = arith.constant dense<0.000000e+00> : vector<1x4x16xf32>
    %213 = tpu.matmul %212, %25, %cst_60 {dimension_numbers = #tpu.dot_dimension_numbers<[2], [2], [1], [1], [0, 0, 0, 1, 1, 1], [0], [0]>} : vector<1x4x32xbf16>, vector<1x16x32xbf16>, vector<1x4x16xf32> -> vector<1x4x16xf32>
    "tpu.trace_stop"() : () -> ()
    %214 = arith.mulf %211, %211 : vector<1x4x32xf32>
    %cst_61 = arith.constant dense<0.000000e+00> : vector<1x4xf32>
    %215 = vector.multi_reduction <add>, %214, %cst_61 [2] : vector<1x4x32xf32> to vector<1x4xf32>
    %216 = vector.shape_cast %215 : vector<1x4xf32> to vector<1x4x1xf32>
    %cst_62 = arith.constant 2.000000e+00 : f32
    %217 = vector.broadcast %cst_62 : f32 to vector<1x4x16xf32>
    %218 = arith.mulf %217, %213 : vector<1x4x16xf32>
    %219 = vector.broadcast %216 : vector<1x4x1xf32> to vector<1x4x16xf32>
    %220 = arith.subf %219, %218 : vector<1x4x16xf32>
    %221 = tpu.iota {dimensions = array<i32: 1>} : vector<1x4x16xi32>
    %cst_63 = arith.constant dense<0x7F800000> : vector<1x16xf32>
    %222 = vector.multi_reduction <minimumf>, %220, %cst_63 [1] : vector<1x4x16xf32> to vector<1x16xf32>
    %223 = vector.shape_cast %222 : vector<1x16xf32> to vector<1x1x16xf32>
    %224 = vector.broadcast %223 : vector<1x1x16xf32> to vector<1x4x16xf32>
    %225 = arith.cmpf ole, %220, %224 : vector<1x4x16xf32>
    %c4_i32_64 = arith.constant 4 : i32
    %226 = vector.broadcast %c4_i32_64 : i32 to vector<1x4x16xi32>
    %227 = arith.select %225, %221, %226 : vector<1x4x16xi1>, vector<1x4x16xi32>
    %cst_65 = arith.constant dense<2147483647> : vector<1x16xi32>
    %228 = vector.multi_reduction <minsi>, %227, %cst_65 [1] : vector<1x4x16xi32> to vector<1x16xi32>
    %229 = vector.shape_cast %228 : vector<1x16xi32> to vector<1x1x16xi32>
    %230 = vector.broadcast %229 : vector<1x1x16xi32> to vector<1x4x16xi32>
    %231 = arith.cmpi eq, %221, %230 : vector<1x4x16xi32>
    %232 = arith.extui %231 : vector<1x4x16xi1> to vector<1x4x16xi32>
    %233 = arith.sitofp %232 : vector<1x4x16xi32> to vector<1x4x16xf32>
    %234 = arith.truncf %233 : vector<1x4x16xf32> to vector<1x4x16xbf16>
    "tpu.trace_start"() <{level = 10 : i32, message = "bkn,bnd->bkd"}> : () -> ()
    %cst_66 = arith.constant dense<0.000000e+00> : vector<1x4x32xf32>
    %235 = tpu.matmul %234, %25, %cst_66 {dimension_numbers = #tpu.dot_dimension_numbers<[2], [1], [1], [2], [0, 0, 0, 1, 1, 2], [0], [0]>} : vector<1x4x16xbf16>, vector<1x16x32xbf16>, vector<1x4x32xf32> -> vector<1x4x32xf32>
    "tpu.trace_stop"() : () -> ()
    %236 = arith.extf %234 : vector<1x4x16xbf16> to vector<1x4x16xf32>
    %cst_67 = arith.constant dense<0.000000e+00> : vector<1x4xf32>
    %237 = vector.multi_reduction <add>, %236, %cst_67 [2] : vector<1x4x16xf32> to vector<1x4xf32>
    %238 = vector.shape_cast %237 : vector<1x4xf32> to vector<1x4x1xf32>
    %cst_68 = arith.constant 1.000000e+00 : f32
    %239 = vector.broadcast %cst_68 : f32 to vector<1x4x1xf32>
    %240 = arith.maximumf %238, %239 : vector<1x4x1xf32>
    %241 = tpu.reciprocal %240 {approx = true} : vector<1x4x1xf32> -> vector<1x4x1xf32>
    %cst_69 = arith.constant 0.000000e+00 : f32
    %242 = vector.broadcast %cst_69 : f32 to vector<1x4x1xf32>
    %243 = arith.cmpf ogt, %238, %242 : vector<1x4x1xf32>
    %244 = vector.broadcast %241 : vector<1x4x1xf32> to vector<1x4x32xf32>
    %245 = arith.mulf %235, %244 : vector<1x4x32xf32>
    %246 = vector.shape_cast %243 : vector<1x4x1xi1> to vector<1x4x1xi1>
    %247 = vector.broadcast %246 : vector<1x4x1xi1> to vector<1x4x32xi1>
    %248 = arith.select %247, %245, %211 : vector<1x4x32xi1>, vector<1x4x32xf32>
    %c6_i32 = arith.constant 6 : i32
    %249 = arith.truncf %248 : vector<1x4x32xf32> to vector<1x4x32xbf16>
    "tpu.trace_start"() <{level = 10 : i32, message = "bkd,bnd->bkn"}> : () -> ()
    %cst_70 = arith.constant dense<0.000000e+00> : vector<1x4x16xf32>
    %250 = tpu.matmul %249, %25, %cst_70 {dimension_numbers = #tpu.dot_dimension_numbers<[2], [2], [1], [1], [0, 0, 0, 1, 1, 1], [0], [0]>} : vector<1x4x32xbf16>, vector<1x16x32xbf16>, vector<1x4x16xf32> -> vector<1x4x16xf32>
    "tpu.trace_stop"() : () -> ()
    %251 = arith.mulf %248, %248 : vector<1x4x32xf32>
    %cst_71 = arith.constant dense<0.000000e+00> : vector<1x4xf32>
    %252 = vector.multi_reduction <add>, %251, %cst_71 [2] : vector<1x4x32xf32> to vector<1x4xf32>
    %253 = vector.shape_cast %252 : vector<1x4xf32> to vector<1x4x1xf32>
    %cst_72 = arith.constant 2.000000e+00 : f32
    %254 = vector.broadcast %cst_72 : f32 to vector<1x4x16xf32>
    %255 = arith.mulf %254, %250 : vector<1x4x16xf32>
    %256 = vector.broadcast %253 : vector<1x4x1xf32> to vector<1x4x16xf32>
    %257 = arith.subf %256, %255 : vector<1x4x16xf32>
    %258 = tpu.iota {dimensions = array<i32: 1>} : vector<1x4x16xi32>
    %cst_73 = arith.constant dense<0x7F800000> : vector<1x16xf32>
    %259 = vector.multi_reduction <minimumf>, %257, %cst_73 [1] : vector<1x4x16xf32> to vector<1x16xf32>
    %260 = vector.shape_cast %259 : vector<1x16xf32> to vector<1x1x16xf32>
    %261 = vector.broadcast %260 : vector<1x1x16xf32> to vector<1x4x16xf32>
    %262 = arith.cmpf ole, %257, %261 : vector<1x4x16xf32>
    %c4_i32_74 = arith.constant 4 : i32
    %263 = vector.broadcast %c4_i32_74 : i32 to vector<1x4x16xi32>
    %264 = arith.select %262, %258, %263 : vector<1x4x16xi1>, vector<1x4x16xi32>
    %cst_75 = arith.constant dense<2147483647> : vector<1x16xi32>
    %265 = vector.multi_reduction <minsi>, %264, %cst_75 [1] : vector<1x4x16xi32> to vector<1x16xi32>
    %266 = vector.shape_cast %265 : vector<1x16xi32> to vector<1x1x16xi32>
    %267 = vector.broadcast %266 : vector<1x1x16xi32> to vector<1x4x16xi32>
    %268 = arith.cmpi eq, %258, %267 : vector<1x4x16xi32>
    %269 = arith.extui %268 : vector<1x4x16xi1> to vector<1x4x16xi32>
    %270 = arith.sitofp %269 : vector<1x4x16xi32> to vector<1x4x16xf32>
    %271 = arith.truncf %270 : vector<1x4x16xf32> to vector<1x4x16xbf16>
    "tpu.trace_start"() <{level = 10 : i32, message = "bkn,bnd->bkd"}> : () -> ()
    %cst_76 = arith.constant dense<0.000000e+00> : vector<1x4x32xf32>
    %272 = tpu.matmul %271, %25, %cst_76 {dimension_numbers = #tpu.dot_dimension_numbers<[2], [1], [1], [2], [0, 0, 0, 1, 1, 2], [0], [0]>} : vector<1x4x16xbf16>, vector<1x16x32xbf16>, vector<1x4x32xf32> -> vector<1x4x32xf32>
    "tpu.trace_stop"() : () -> ()
    %273 = arith.extf %271 : vector<1x4x16xbf16> to vector<1x4x16xf32>
    %cst_77 = arith.constant dense<0.000000e+00> : vector<1x4xf32>
    %274 = vector.multi_reduction <add>, %273, %cst_77 [2] : vector<1x4x16xf32> to vector<1x4xf32>
    %275 = vector.shape_cast %274 : vector<1x4xf32> to vector<1x4x1xf32>
    %cst_78 = arith.constant 1.000000e+00 : f32
    %276 = vector.broadcast %cst_78 : f32 to vector<1x4x1xf32>
    %277 = arith.maximumf %275, %276 : vector<1x4x1xf32>
    %278 = tpu.reciprocal %277 {approx = true} : vector<1x4x1xf32> -> vector<1x4x1xf32>
    %cst_79 = arith.constant 0.000000e+00 : f32
    %279 = vector.broadcast %cst_79 : f32 to vector<1x4x1xf32>
    %280 = arith.cmpf ogt, %275, %279 : vector<1x4x1xf32>
    %281 = vector.broadcast %278 : vector<1x4x1xf32> to vector<1x4x32xf32>
    %282 = arith.mulf %272, %281 : vector<1x4x32xf32>
    %283 = vector.shape_cast %280 : vector<1x4x1xi1> to vector<1x4x1xi1>
    %284 = vector.broadcast %283 : vector<1x4x1xi1> to vector<1x4x32xi1>
    %285 = arith.select %284, %282, %248 : vector<1x4x32xi1>, vector<1x4x32xf32>
    %c7_i32 = arith.constant 7 : i32
    %286 = arith.truncf %285 : vector<1x4x32xf32> to vector<1x4x32xbf16>
    "tpu.trace_start"() <{level = 10 : i32, message = "bkd,bnd->bkn"}> : () -> ()
    %cst_80 = arith.constant dense<0.000000e+00> : vector<1x4x16xf32>
    %287 = tpu.matmul %286, %25, %cst_80 {dimension_numbers = #tpu.dot_dimension_numbers<[2], [2], [1], [1], [0, 0, 0, 1, 1, 1], [0], [0]>} : vector<1x4x32xbf16>, vector<1x16x32xbf16>, vector<1x4x16xf32> -> vector<1x4x16xf32>
    "tpu.trace_stop"() : () -> ()
    %288 = arith.mulf %285, %285 : vector<1x4x32xf32>
    %cst_81 = arith.constant dense<0.000000e+00> : vector<1x4xf32>
    %289 = vector.multi_reduction <add>, %288, %cst_81 [2] : vector<1x4x32xf32> to vector<1x4xf32>
    %290 = vector.shape_cast %289 : vector<1x4xf32> to vector<1x4x1xf32>
    %cst_82 = arith.constant 2.000000e+00 : f32
    %291 = vector.broadcast %cst_82 : f32 to vector<1x4x16xf32>
    %292 = arith.mulf %291, %287 : vector<1x4x16xf32>
    %293 = vector.broadcast %290 : vector<1x4x1xf32> to vector<1x4x16xf32>
    %294 = arith.subf %293, %292 : vector<1x4x16xf32>
    %295 = tpu.iota {dimensions = array<i32: 1>} : vector<1x4x16xi32>
    %cst_83 = arith.constant dense<0x7F800000> : vector<1x16xf32>
    %296 = vector.multi_reduction <minimumf>, %294, %cst_83 [1] : vector<1x4x16xf32> to vector<1x16xf32>
    %297 = vector.shape_cast %296 : vector<1x16xf32> to vector<1x1x16xf32>
    %298 = vector.broadcast %297 : vector<1x1x16xf32> to vector<1x4x16xf32>
    %299 = arith.cmpf ole, %294, %298 : vector<1x4x16xf32>
    %c4_i32_84 = arith.constant 4 : i32
    %300 = vector.broadcast %c4_i32_84 : i32 to vector<1x4x16xi32>
    %301 = arith.select %299, %295, %300 : vector<1x4x16xi1>, vector<1x4x16xi32>
    %cst_85 = arith.constant dense<2147483647> : vector<1x16xi32>
    %302 = vector.multi_reduction <minsi>, %301, %cst_85 [1] : vector<1x4x16xi32> to vector<1x16xi32>
    %303 = vector.shape_cast %302 : vector<1x16xi32> to vector<1x1x16xi32>
    %304 = vector.broadcast %303 : vector<1x1x16xi32> to vector<1x4x16xi32>
    %305 = arith.cmpi eq, %295, %304 : vector<1x4x16xi32>
    %306 = arith.extui %305 : vector<1x4x16xi1> to vector<1x4x16xi32>
    %307 = arith.sitofp %306 : vector<1x4x16xi32> to vector<1x4x16xf32>
    %308 = arith.truncf %307 : vector<1x4x16xf32> to vector<1x4x16xbf16>
    "tpu.trace_start"() <{level = 10 : i32, message = "bkn,bnd->bkd"}> : () -> ()
    %cst_86 = arith.constant dense<0.000000e+00> : vector<1x4x32xf32>
    %309 = tpu.matmul %308, %25, %cst_86 {dimension_numbers = #tpu.dot_dimension_numbers<[2], [1], [1], [2], [0, 0, 0, 1, 1, 2], [0], [0]>} : vector<1x4x16xbf16>, vector<1x16x32xbf16>, vector<1x4x32xf32> -> vector<1x4x32xf32>
    "tpu.trace_stop"() : () -> ()
    %310 = arith.extf %308 : vector<1x4x16xbf16> to vector<1x4x16xf32>
    %cst_87 = arith.constant dense<0.000000e+00> : vector<1x4xf32>
    %311 = vector.multi_reduction <add>, %310, %cst_87 [2] : vector<1x4x16xf32> to vector<1x4xf32>
    %312 = vector.shape_cast %311 : vector<1x4xf32> to vector<1x4x1xf32>
    %cst_88 = arith.constant 1.000000e+00 : f32
    %313 = vector.broadcast %cst_88 : f32 to vector<1x4x1xf32>
    %314 = arith.maximumf %312, %313 : vector<1x4x1xf32>
    %315 = tpu.reciprocal %314 {approx = true} : vector<1x4x1xf32> -> vector<1x4x1xf32>
    %cst_89 = arith.constant 0.000000e+00 : f32
    %316 = vector.broadcast %cst_89 : f32 to vector<1x4x1xf32>
    %317 = arith.cmpf ogt, %312, %316 : vector<1x4x1xf32>
    %318 = vector.broadcast %315 : vector<1x4x1xf32> to vector<1x4x32xf32>
    %319 = arith.mulf %309, %318 : vector<1x4x32xf32>
    %320 = vector.shape_cast %317 : vector<1x4x1xi1> to vector<1x4x1xi1>
    %321 = vector.broadcast %320 : vector<1x4x1xi1> to vector<1x4x32xi1>
    %322 = arith.select %321, %319, %285 : vector<1x4x32xi1>, vector<1x4x32xf32>
    %c8_i32 = arith.constant 8 : i32
    %323 = arith.truncf %322 : vector<1x4x32xf32> to vector<1x4x32xbf16>
    "tpu.trace_start"() <{level = 10 : i32, message = "bkd,bnd->bkn"}> : () -> ()
    %cst_90 = arith.constant dense<0.000000e+00> : vector<1x4x16xf32>
    %324 = tpu.matmul %323, %25, %cst_90 {dimension_numbers = #tpu.dot_dimension_numbers<[2], [2], [1], [1], [0, 0, 0, 1, 1, 1], [0], [0]>} : vector<1x4x32xbf16>, vector<1x16x32xbf16>, vector<1x4x16xf32> -> vector<1x4x16xf32>
    "tpu.trace_stop"() : () -> ()
    %325 = arith.mulf %322, %322 : vector<1x4x32xf32>
    %cst_91 = arith.constant dense<0.000000e+00> : vector<1x4xf32>
    %326 = vector.multi_reduction <add>, %325, %cst_91 [2] : vector<1x4x32xf32> to vector<1x4xf32>
    %327 = vector.shape_cast %326 : vector<1x4xf32> to vector<1x4x1xf32>
    %cst_92 = arith.constant 2.000000e+00 : f32
    %328 = vector.broadcast %cst_92 : f32 to vector<1x4x16xf32>
    %329 = arith.mulf %328, %324 : vector<1x4x16xf32>
    %330 = vector.broadcast %327 : vector<1x4x1xf32> to vector<1x4x16xf32>
    %331 = arith.subf %330, %329 : vector<1x4x16xf32>
    %332 = tpu.iota {dimensions = array<i32: 1>} : vector<1x4x16xi32>
    %cst_93 = arith.constant dense<0x7F800000> : vector<1x16xf32>
    %333 = vector.multi_reduction <minimumf>, %331, %cst_93 [1] : vector<1x4x16xf32> to vector<1x16xf32>
    %334 = vector.shape_cast %333 : vector<1x16xf32> to vector<1x1x16xf32>
    %335 = vector.broadcast %334 : vector<1x1x16xf32> to vector<1x4x16xf32>
    %336 = arith.cmpf ole, %331, %335 : vector<1x4x16xf32>
    %c4_i32_94 = arith.constant 4 : i32
    %337 = vector.broadcast %c4_i32_94 : i32 to vector<1x4x16xi32>
    %338 = arith.select %336, %332, %337 : vector<1x4x16xi1>, vector<1x4x16xi32>
    %cst_95 = arith.constant dense<2147483647> : vector<1x16xi32>
    %339 = vector.multi_reduction <minsi>, %338, %cst_95 [1] : vector<1x4x16xi32> to vector<1x16xi32>
    %340 = vector.shape_cast %339 : vector<1x16xi32> to vector<1x1x16xi32>
    %341 = vector.broadcast %340 : vector<1x1x16xi32> to vector<1x4x16xi32>
    %342 = arith.cmpi eq, %332, %341 : vector<1x4x16xi32>
    %343 = arith.extui %342 : vector<1x4x16xi1> to vector<1x4x16xi32>
    %344 = arith.sitofp %343 : vector<1x4x16xi32> to vector<1x4x16xf32>
    %345 = arith.truncf %344 : vector<1x4x16xf32> to vector<1x4x16xbf16>
    "tpu.trace_start"() <{level = 10 : i32, message = "bkn,bnd->bkd"}> : () -> ()
    %cst_96 = arith.constant dense<0.000000e+00> : vector<1x4x32xf32>
    %346 = tpu.matmul %345, %25, %cst_96 {dimension_numbers = #tpu.dot_dimension_numbers<[2], [1], [1], [2], [0, 0, 0, 1, 1, 2], [0], [0]>} : vector<1x4x16xbf16>, vector<1x16x32xbf16>, vector<1x4x32xf32> -> vector<1x4x32xf32>
    "tpu.trace_stop"() : () -> ()
    %347 = arith.extf %345 : vector<1x4x16xbf16> to vector<1x4x16xf32>
    %cst_97 = arith.constant dense<0.000000e+00> : vector<1x4xf32>
    %348 = vector.multi_reduction <add>, %347, %cst_97 [2] : vector<1x4x16xf32> to vector<1x4xf32>
    %349 = vector.shape_cast %348 : vector<1x4xf32> to vector<1x4x1xf32>
    %cst_98 = arith.constant 1.000000e+00 : f32
    %350 = vector.broadcast %cst_98 : f32 to vector<1x4x1xf32>
    %351 = arith.maximumf %349, %350 : vector<1x4x1xf32>
    %352 = tpu.reciprocal %351 {approx = true} : vector<1x4x1xf32> -> vector<1x4x1xf32>
    %cst_99 = arith.constant 0.000000e+00 : f32
    %353 = vector.broadcast %cst_99 : f32 to vector<1x4x1xf32>
    %354 = arith.cmpf ogt, %349, %353 : vector<1x4x1xf32>
    %355 = vector.broadcast %352 : vector<1x4x1xf32> to vector<1x4x32xf32>
    %356 = arith.mulf %346, %355 : vector<1x4x32xf32>
    %357 = vector.shape_cast %354 : vector<1x4x1xi1> to vector<1x4x1xi1>
    %358 = vector.broadcast %357 : vector<1x4x1xi1> to vector<1x4x32xi1>
    %359 = arith.select %358, %356, %322 : vector<1x4x32xi1>, vector<1x4x32xf32>
    %c9_i32 = arith.constant 9 : i32
    %360 = arith.truncf %359 : vector<1x4x32xf32> to vector<1x4x32xbf16>
    "tpu.trace_start"() <{level = 10 : i32, message = "bkd,bnd->bkn"}> : () -> ()
    %cst_100 = arith.constant dense<0.000000e+00> : vector<1x4x16xf32>
    %361 = tpu.matmul %360, %25, %cst_100 {dimension_numbers = #tpu.dot_dimension_numbers<[2], [2], [1], [1], [0, 0, 0, 1, 1, 1], [0], [0]>} : vector<1x4x32xbf16>, vector<1x16x32xbf16>, vector<1x4x16xf32> -> vector<1x4x16xf32>
    "tpu.trace_stop"() : () -> ()
    %362 = arith.mulf %359, %359 : vector<1x4x32xf32>
    %cst_101 = arith.constant dense<0.000000e+00> : vector<1x4xf32>
    %363 = vector.multi_reduction <add>, %362, %cst_101 [2] : vector<1x4x32xf32> to vector<1x4xf32>
    %364 = vector.shape_cast %363 : vector<1x4xf32> to vector<1x4x1xf32>
    %cst_102 = arith.constant 2.000000e+00 : f32
    %365 = vector.broadcast %cst_102 : f32 to vector<1x4x16xf32>
    %366 = arith.mulf %365, %361 : vector<1x4x16xf32>
    %367 = vector.broadcast %364 : vector<1x4x1xf32> to vector<1x4x16xf32>
    %368 = arith.subf %367, %366 : vector<1x4x16xf32>
    %369 = tpu.iota {dimensions = array<i32: 1>} : vector<1x4x16xi32>
    %cst_103 = arith.constant dense<0x7F800000> : vector<1x16xf32>
    %370 = vector.multi_reduction <minimumf>, %368, %cst_103 [1] : vector<1x4x16xf32> to vector<1x16xf32>
    %371 = vector.shape_cast %370 : vector<1x16xf32> to vector<1x1x16xf32>
    %372 = vector.broadcast %371 : vector<1x1x16xf32> to vector<1x4x16xf32>
    %373 = arith.cmpf ole, %368, %372 : vector<1x4x16xf32>
    %c4_i32_104 = arith.constant 4 : i32
    %374 = vector.broadcast %c4_i32_104 : i32 to vector<1x4x16xi32>
    %375 = arith.select %373, %369, %374 : vector<1x4x16xi1>, vector<1x4x16xi32>
    %cst_105 = arith.constant dense<2147483647> : vector<1x16xi32>
    %376 = vector.multi_reduction <minsi>, %375, %cst_105 [1] : vector<1x4x16xi32> to vector<1x16xi32>
    %377 = vector.shape_cast %376 : vector<1x16xi32> to vector<1x1x16xi32>
    %378 = vector.broadcast %377 : vector<1x1x16xi32> to vector<1x4x16xi32>
    %379 = arith.cmpi eq, %369, %378 : vector<1x4x16xi32>
    %380 = arith.extui %379 : vector<1x4x16xi1> to vector<1x4x16xi32>
    %381 = arith.sitofp %380 : vector<1x4x16xi32> to vector<1x4x16xf32>
    %382 = arith.truncf %381 : vector<1x4x16xf32> to vector<1x4x16xbf16>
    "tpu.trace_start"() <{level = 10 : i32, message = "bkn,bnd->bkd"}> : () -> ()
    %cst_106 = arith.constant dense<0.000000e+00> : vector<1x4x32xf32>
    %383 = tpu.matmul %382, %25, %cst_106 {dimension_numbers = #tpu.dot_dimension_numbers<[2], [1], [1], [2], [0, 0, 0, 1, 1, 2], [0], [0]>} : vector<1x4x16xbf16>, vector<1x16x32xbf16>, vector<1x4x32xf32> -> vector<1x4x32xf32>
    "tpu.trace_stop"() : () -> ()
    %384 = arith.extf %382 : vector<1x4x16xbf16> to vector<1x4x16xf32>
    %cst_107 = arith.constant dense<0.000000e+00> : vector<1x4xf32>
    %385 = vector.multi_reduction <add>, %384, %cst_107 [2] : vector<1x4x16xf32> to vector<1x4xf32>
    %386 = vector.shape_cast %385 : vector<1x4xf32> to vector<1x4x1xf32>
    %cst_108 = arith.constant 1.000000e+00 : f32
    %387 = vector.broadcast %cst_108 : f32 to vector<1x4x1xf32>
    %388 = arith.maximumf %386, %387 : vector<1x4x1xf32>
    %389 = tpu.reciprocal %388 {approx = true} : vector<1x4x1xf32> -> vector<1x4x1xf32>
    %cst_109 = arith.constant 0.000000e+00 : f32
    %390 = vector.broadcast %cst_109 : f32 to vector<1x4x1xf32>
    %391 = arith.cmpf ogt, %386, %390 : vector<1x4x1xf32>
    %392 = vector.broadcast %389 : vector<1x4x1xf32> to vector<1x4x32xf32>
    %393 = arith.mulf %383, %392 : vector<1x4x32xf32>
    %394 = vector.shape_cast %391 : vector<1x4x1xi1> to vector<1x4x1xi1>
    %395 = vector.broadcast %394 : vector<1x4x1xi1> to vector<1x4x32xi1>
    %396 = arith.select %395, %393, %359 : vector<1x4x32xi1>, vector<1x4x32xf32>
    %397 = arith.truncf %396 : vector<1x4x32xf32> to vector<1x4x32xbf16>
    "tpu.trace_start"() <{level = 10 : i32, message = "bnd,bkd->bnk"}> : () -> ()
    %cst_110 = arith.constant dense<0.000000e+00> : vector<1x16x4xf32>
    %398 = tpu.matmul %25, %397, %cst_110 {dimension_numbers = #tpu.dot_dimension_numbers<[2], [2], [1], [1], [0, 0, 0, 1, 1, 1], [0], [0]>} : vector<1x16x32xbf16>, vector<1x4x32xbf16>, vector<1x16x4xf32> -> vector<1x16x4xf32>
    "tpu.trace_stop"() : () -> ()
    %399 = arith.mulf %396, %396 : vector<1x4x32xf32>
    %cst_111 = arith.constant dense<0.000000e+00> : vector<1x4xf32>
    %400 = vector.multi_reduction <add>, %399, %cst_111 [2] : vector<1x4x32xf32> to vector<1x4xf32>
    %401 = vector.shape_cast %400 : vector<1x4xf32> to vector<1x1x4xf32>
    %cst_112 = arith.constant 2.000000e+00 : f32
    %402 = vector.broadcast %cst_112 : f32 to vector<1x16x4xf32>
    %403 = arith.mulf %402, %398 : vector<1x16x4xf32>
    %404 = vector.broadcast %401 : vector<1x1x4xf32> to vector<1x16x4xf32>
    %405 = arith.subf %403, %404 : vector<1x16x4xf32>
    %cst_113 = arith.constant dense<0xFF800000> : vector<1x16xf32>
    %406 = vector.multi_reduction <maximumf>, %405, %cst_113 [2] : vector<1x16x4xf32> to vector<1x16xf32>
    %407 = vector.shape_cast %406 : vector<1x16xf32> to vector<1x16x1xf32>
    %408 = vector.broadcast %407 : vector<1x16x1xf32> to vector<1x16x4xf32>
    %409 = arith.subf %405, %408 : vector<1x16x4xf32>
    %410 = math.exp %409 : vector<1x16x4xf32>
    %cst_114 = arith.constant dense<0.000000e+00> : vector<1x16xf32>
    %411 = vector.multi_reduction <add>, %410, %cst_114 [2] : vector<1x16x4xf32> to vector<1x16xf32>
    %412 = vector.shape_cast %411 : vector<1x16xf32> to vector<1x16x1xf32>
    %413 = vector.broadcast %412 : vector<1x16x1xf32> to vector<1x16x4xf32>
    %414 = arith.divf %410, %413 : vector<1x16x4xf32>
    %c0_115 = arith.constant 0 : index
    %c0_116 = arith.constant 0 : index
    %c0_117 = arith.constant 0 : index
    %415 = vector.load %arg4[%c0_115, %c0_116, %c0_117] : memref<1x4x32xf32, #tpu.memory_space<vmem>>, vector<1x4x32xf32>
    tpu.vector_store %arg4[%c0_115, %c0_116, %c0_117], %396 {strides = array<i32>} : memref<1x4x32xf32, #tpu.memory_space<vmem>>, vector<1x4x32xf32>,
    %c0_118 = arith.constant 0 : index
    %c0_119 = arith.constant 0 : index
    %c0_120 = arith.constant 0 : index
    %416 = vector.load %arg5[%c0_118, %c0_119, %c0_120] : memref<1x16x4xf32, #tpu.memory_space<vmem>>, vector<1x16x4xf32>
    tpu.vector_store %arg5[%c0_118, %c0_119, %c0_120], %414 {strides = array<i32>} : memref<1x16x4xf32, #tpu.memory_space<vmem>>, vector<1x16x4xf32>,
    return
  }
  func.func @transform_0(%arg0: i32) -> (i32, i32, i32) {
    %c0_i32 = arith.constant 0 : i32
    %c0_i32_0 = arith.constant 0 : i32
    %c0_i32_1 = arith.constant 0 : i32
    return %arg0, %c0_i32, %c0_i32_0 : i32, i32, i32
  }
  func.func @transform_1(%arg0: i32) -> (i32, i32) {
    %c0_i32 = arith.constant 0 : i32
    %c0_i32_0 = arith.constant 0 : i32
    %c0_i32_1 = arith.constant 0 : i32
    return %c0_i32, %c0_i32_0 : i32, i32
  }
  func.func @transform_2(%arg0: i32) -> (i32, i32) {
    %c0_i32 = arith.constant 0 : i32
    %c0_i32_0 = arith.constant 0 : i32
    %c0_i32_1 = arith.constant 0 : i32
    return %c0_i32, %c0_i32_0 : i32, i32
  }
  func.func @transform_3(%arg0: i32) -> (i32, i32, i32) {
    %c0_i32 = arith.constant 0 : i32
    %c0_i32_0 = arith.constant 0 : i32
    %c0_i32_1 = arith.constant 0 : i32
    return %arg0, %c0_i32, %c0_i32_0 : i32, i32, i32
  }
  func.func @transform_4(%arg0: i32) -> (i32, i32, i32) {
    %c0_i32 = arith.constant 0 : i32
    %c0_i32_0 = arith.constant 0 : i32
    %c0_i32_1 = arith.constant 0 : i32
    return %arg0, %c0_i32, %c0_i32_0 : i32, i32, i32
  }
}

</mosaic_0001>

<bundles_post_ra>
// kernel: tpu_custom_call.1
= control target key start
LH: loop header
LB: loop body
LE: loop exit
PB: predicated region body
PF: predicated region fallthrough
CT: control target
= control target key end

     0   :  { %10 = vsyncpa [#allocation3], 0  ;;  %s2579_s0 = inlined_call_operand.hbm [shape: f32[2,16,32], index: 0, kind: input, shape index: {}]   ;;  %s2580_s1 = inlined_call_operand.vmem [shape: f32[1,32], index: 1, kind: input, shape index: {}]   ;;  %s2581_s2 = inlined_call_operand.vmem [shape: f32[1,32], index: 2, kind: input, shape index: {}]   ;;  %s2582_s3 = inlined_call_operand.hbm [shape: f32[2,4,32], index: 3, kind: output, shape index: {0}]   ;;  %s2583_s4 = inlined_call_operand.vmem [shape: f32[2,16,4], index: 4, kind: output, shape index: {1}]  }
   0x1   :  { %12 = vsyncpa [#allocation3 + $0x1], 0 }
   0x2   :  { %13 = vsyncpa [#allocation4], 0 }
   0x3   :  { %15 = vsyncpa [#allocation4 + $0x1], 0  ;;  %s2202_s15 = smov 0   ;;  %s2204_s16 = smov 0  }
   0x4   :  { %s2206_s17 = smov 0   ;;  %s2208_s18 = smov 0  }
   0x5 LB: > { %s2223_s19 = sadd.s32 4294967295, %s2169_s18   ;;  %s1773_s20 = sadd.s32 4294967294, %s2169_s18   ;;  %s2169_s18 = sphi %s2208_s18, %s2596_s18   ;;  %s2165_s17 = sphi %s2206_s17, %s2595_s17   ;;  %s2161_s16 = sphi %s2204_s16, %s2594_s16   ;;  %s2157_s15 = sphi %s2202_s15, %s2593_s15  }
   0x6   : > { %s2227_s21 = sadd.s32 1, %s2169_s18   ;;  %s28_s22 = sadd.s32 1, %s2165_s17 }
   0x7   : > { %s25_s23 = ssub.s32 %s2169_s18, %s2227_s21  ;;  %p35_p0 = scmp.ne.s32.totalorder %s2165_s17, %s2161_s16 }
   0x8   : > { %p26_p1 = scmp.eq.s32.totalorder %s25_s23, 0  ;;  %p36_p2 = scmp.eq.s32.totalorder %s2169_s18, 0 }
   0x9   : > { %p41_p3 = scmp.ne.s32.totalorder %s2161_s16, %s2157_s15  ;;  %p42_p4 = scmp.eq.s32.totalorder %s2223_s19, 0 }
   0xa   : > { %s2239_s24 = scalar_select %p26_p1, %s2165_s17, %s28_s22  }
   0xb   : > { %p2241_p5 = por %p36_p2, %p35_p0  ;;  %p2245_p6 = por %p42_p4, %p41_p3 }
   0xc   : > { %p107_p7 = scmp.eq.s32.totalorder %s2223_s19, 1  ;;  %p113_p8 = scmp.eq.s32.totalorder %s1773_s20, 1 }
   0xd   : > { %p2003_p10 = scmp.lt.s32.totalorder %s2169_s18, 2  ;;  %s165_s29 = sand.u32 1, %s2165_s17  }
   0xe   : > { %p2252_p11 = por %p107_p7, %p35_p0  ;;  %p2256_p12 = por %p113_p8, %p41_p3 }
   0xf   : > { %s1821_s30 = sshll.u32 %s2169_s18, 8  ;;  %s1776_s5 = sshll.u32 %s165_s29, 4 }
  0x10   : > { %s2587_s27 = scalar_select %p2252_p11, 1, 0 }
  0x11   : > { %s2588_s28 = scalar_select %p2256_p12, 1, 0 }
  0x12   : > { %s2265_s8 = scalar_lea.hbm %s2579_s0, %s1821_s30  ;;  %s169_s9 = scalar_lea.vmem [#allocation2], %s1776_s5 }
  0x13   : > { %s176_s10 = sshll.u32 %s169_s9, 4  ;;  %p2269_p13 = pnand %p2003_p10, %p2241_p5  ;;  %s2273_s10 = int_to_ptr.vmem [resolvable:$true] %s176_s10 }
  0x14   : > { %s2275_s12 = scalar_lea.sflag [#allocation3], %s165_s29  ;;  %s2073_s13 = scalar_lea.hbm %s2265_s8, 256 }
  0x15   : > { %p2074_p0 = scmp.ne.s32.totalorder %s2265_s8, %s2073_s13  ;;  %p2075_p1 = pneg %p2269_p13 }
  0x16   : > { %s2078_s22 = scalar_lea.hbm %s2579_s0, 512  ;;  %p2079_p4 = scmp.lt.u32.totalorder %s2265_s8, %s2579_s0 }
  0x17   : > { %p2076_p2 = pnand %p2075_p1, %p2074_p0  ;;  %p2080_p5 = scmp.lt.u32.totalorder %s2078_s22, %s2073_s13 }
  0x18   : > { %p2082_p8 = scmp.lt.u32.totalorder %s2073_s13, %s2265_s8 }
  0x19   : > { %p2077_p3 = pneg %p2076_p2  ;;  %p2081_p7 = por %p2080_p5, %p2079_p4 }
  0x1b   : > { %p2083_p10 = por %p2082_p8, %p2081_p7 }
  0x1d   : > { %p2084_p9 = pnand %p2083_p10, %p2077_p3 }
  0x1f   : > { %2087 = shalt.err (!%p2084_p9)
}
  0x20   : > { %s2088_s29 = scalar_lea.vmem %s2273_s10, 256  ;;  %s2171_s30 = smov [#allocation2]  }
  0x21   : > { %p2089_p0 = scmp.ne.s32.totalorder %s2273_s10, %s2088_s29  ;;  %s2093_s5 = sshll.u32 %s2171_s30, 4  ;;  %s2094_s5 = int_to_ptr.vmem [resolvable:$false] %s2093_s5 }
  0x22   : > { %s2095_s6 = scalar_lea.vmem %s2094_s5, 512  ;;  %p2096_p11 = scmp.lt.s32.totalorder %s2273_s10, %s2094_s5 }
  0x23   : > { %p2091_p2 = pnand %p2089_p0, %p2075_p1  ;;  %p2097_p4 = scmp.lt.s32.totalorder %s2095_s6, %s2088_s29 }
  0x25   : > { %p2092_p12 = pneg %p2091_p2  ;;  %p2098_p5 = por %p2097_p4, %p2096_p11 }
  0x27   : > { %p2099_p7 = pnand %p2098_p5, %p2092_p12 }
  0x29   : > { %2102 = shalt.err (!%p2099_p7)
}
  0x2a   : > { %s2172_s7 = smov 128   ;;  %s2173_s9 = smov 8  }
  0x2b   : > { %1998 = dma.hbm_to_vmem [thread:$0]  (!%p2269_p13), %s2265_s8, 256, %s2273_s10, %s2275_s12, %s2172_s7, %s2172_s7, %s2173_s9  }
  0x2c   : > { %p1779_p9 = scmp.ge.s32.totalorder %s2169_s18, 1  ;;  %p184_p1 = scmp.lt.s32.totalorder %s2169_s18, 3 }
  0x2e   : > { %p185_p3 = pnand %p1779_p9, %p184_p1 }
  0x2f   : > { %s2306_s13 = sand.u32 (!%p185_p3), 1, %s2161_s16  }
  0x30   : > { %188 = sbr.rel (%p185_p3) target bundleno = 5575 (0x15c7), region = 32  ;;  %s1780_s14 = sshll.u32 (!%p185_p3), %s2306_s13, 4 }
  0x31   : > { %s191_s20 = scalar_lea.sflag (!%p185_p3), [#allocation3], %s2306_s13  ;;  %s194_s22 = scalar_lea.vmem (!%p185_p3), [#allocation2], %s1780_s14 }
  0x37   : > { %2148 = dma.done.wait (%p2245_p6), %s191_s20, 256  }
  0x38   : > { %2150 = vsyncadd (%p2245_p6), %s191_s20, 4294967040  ;;  %vm232_vm0 = vcmask 261120   ;;  %v230_v0 = vld [vmem:[%s194_s22] sm:$0xff]  ;;  %v231_v1 = vld [vmem:[%s194_s22 + $0x8] sm:$0xff]  ;;  %v2174_v14 = vmov 0.0   ;;  %vm2175_vm1 = vmmov 0   ;;  %v333_v47 = vlaneseq }
  0x39   : > { %v233_v2 = vsel %vm232_vm0, %v230_v0, 0.0  ;;  %v236_v3 = vsel %vm232_vm0, %v231_v1, 0.0  ;;  %1871 = vmatprep.subr.bf16.mxu1 %v2174_v14  ;;  %1865 = vmatprep.subr.bf16.mxu0 %v2174_v14  ;;  %v1784_v22 = vld [vmem:[%s2580_s1] ss:$0 sm:$0xff]  ;;  %vm327_vm2 = vcmask 257024   ;;  %vm335_vm3 = vcmask 125952  }
  0x3a   : > { %234 = vadd.xlane.f32.xlu0 %v233_v2  ;;  %1867 = vmatprep.mubr.msk.bf16.mxu0 %vm2175_vm1, %v2174_v14  ;;  %v1785_v24 = vld [vmem:[%s2581_s2] ss:$0 sm:$0xff]  ;;  %v2355_v50 = vshrl.u32 %v333_v47, 7  ;;  %vm359_vm9 = vcmask 130048   ;;  %s1781_s12 = sshll.u32 %s2306_s13, 2  ;;  %s1818_s25 = sshll.u32 %s2223_s19, 6 }
  0x3b   : > { %1873 = vmatprep.mubr.msk.bf16.mxu1 %vm2175_vm1, %v2174_v14  ;;  %s2515_s23 = scalar_lea.vmem [#allocation5], %s1781_s12  ;;  %s2534_s6 = scalar_lea.hbm %s2582_s3, %s1818_s25 }
  0x3c   : > { %s1675_s29 = sshll.u32 %s2515_s23, 4  ;;  %s1657_s7 = scalar_lea.sflag [#allocation4], %s2306_s13  ;;  %s1676_s29 = int_to_ptr.vmem [resolvable:$true] %s1675_s29 }
  0x3d   : > { %s2103_s9 = scalar_lea.vmem %s1676_s29, 64  ;;  %p2590_p11 = scmp.ne.s32.totalorder %s2587_s27, 0 }
  0x3e   : > { %237 = vadd.xlane.f32.xlu0 %v236_v3  ;;  %p2104_p6 = scmp.ne.s32.totalorder %s1676_s29, %s2103_s9  ;;  %s2176_s14 = smov [#allocation5]  }
  0x3f   : > { %s2107_s20 = sshll.u32 %s2176_s14, 4  ;;  %s2108_s20 = int_to_ptr.vmem [resolvable:$false] %s2107_s20 }
  0x40   : > { %p2105_p12 = pnand %p2104_p6, %p2590_p11  ;;  %s2109_s22 = scalar_lea.vmem %s2108_s20, 128 }
  0x41   : > { %p2110_p8 = scmp.lt.s32.totalorder %s1676_s29, %s2108_s20  ;;  %p2111_p10 = scmp.lt.s32.totalorder %s2109_s22, %s2103_s9 }
  0x42   : > { %p2106_p13 = pneg %p2105_p12 }
  0x43   : > { %p2112_p0 = por %p2111_p10, %p2110_p8 }
  0x45   : > { %p2113_p2 = pnand %p2112_p0, %p2106_p13 }
  0xc7   : > { %v235_v4 = vpop.xlane.xlu0 %234 }
  0xc8   : > { %v240_v5 = vmul.f32 0.03125, %v235_v4 }
  0xca   : > { %v242_v6 = vsub.f32 %v230_v0, %v240_v5 }
  0xcb   : > { %v238_v7 = vpop.xlane.xlu0 %237 }
  0xcc   : > { %v241_v8 = vmul.f32 0.03125, %v238_v7  ;;  %v244_v9 = vmul.f32 %v242_v6, %v242_v6 }
  0xce   : > { %v243_v10 = vsub.f32 %v231_v1, %v241_v8  ;;  %v246_v11 = vsel %vm232_vm0, %v244_v9, 0.0 }
  0xcf   : > { %247 = vadd.xlane.f32.xlu1 %v246_v11 }
  0xd0   : > { %v245_v12 = vmul.f32 %v243_v10, %v243_v10 }
  0xd2   : > { %v249_v13 = vsel %vm232_vm0, %v245_v12, 0.0 }
  0xd3   : > { %250 = vadd.xlane.f32.xlu1 %v249_v13 }
 0x15c   : > { %v248_v15 = vpop.xlane.xlu1 %247 }
 0x15d   : > { %v252_v16 = vmul.f32 0.03125, %v248_v15 }
 0x15f   : > { %v254_v17 = vadd.f32 1e-05, %v252_v16 }
 0x160   : > { %v251_v18 = vpop.xlane.xlu1 %250 }
 0x161   : > { %2041 = vrsqrt.f32 %v254_v17  ;;  %v253_v19 = vmul.f32 0.03125, %v251_v18 }
 0x163   : > { %v255_v20 = vadd.f32 1e-05, %v253_v19 }
 0x165   : > { %2043 = vrsqrt.f32 %v255_v20 }
 0x16b   : > { %v2042_v21 = vpop.eup %2041 }
 0x16c   : > { %v258_v23 = vmul.f32 %v2042_v21, %v242_v6 }
 0x16e   : > { %v267_v25 = vmul.f32 %v1784_v22, %v258_v23 }
 0x16f   : > { %v2044_v26 = vpop.eup %2043 }
 0x170   : > { %v259_v27 = vmul.f32 %v2044_v26, %v243_v10  ;;  %v2330_v28 = vadd.f32 %v1785_v24, %v267_v25 }
 0x172   : > { %v326_v29 = vmul.f32 %v2330_v28, %v2330_v28  ;;  %v268_v30 = vmul.f32 %v1784_v22, %v259_v27  ;;  %v279_v35 = vpack.c.bf16 %v2330_v28, %v2330_v28 }
 0x174   : > { %v328_v31 = vsel %vm327_vm2, %v326_v29, 0.0  ;;  %v277_v32 = vadd.f32 %v1785_v24, %v268_v30 }
 0x175   : > { %329 = vadd.xlane.f32.xlu0 %v328_v31 }
 0x176   : > { %v2336_v33 = vpack.c.bf16 %v277_v32, %v2330_v28 }
 0x178   : > { %1872 = vmatpush3.bf16.msra.mxu1 %v2336_v33  ;;  %v2341_v34 = vsel %vm232_vm0, %v2336_v33, 0 }
 0x179   : > { %1866 = vmatpush3.bf16.xpose.msra.mxu0 %v2341_v34  ;;  %1877 = vmatprep.subr.bf16.mxu1 %v2174_v14 }
 0x17a   : > { %1883 = vmatprep.subr.bf16.mxu0 %v2174_v14 }
 0x180   : > { %1868 = vmatmul.mubr.msk.bf16.vlgmr.msra.gmra.mrb[0].mxu0 %vm232_vm0, %v279_v35 }
 0x181   : > { %1884 = vmatpush3.bf16.msra.mxu0 %v2336_v33  ;;  %1885 = vmatprep.mubr.msk.bf16.mxu0 %vm2175_vm1, %v2174_v14 }
 0x182   : > { %1895 = vmatprep.subr.bf16.mxu0 %v2174_v14 }
 0x202   : > { %v330_v39 = vpop.xlane.xlu0 %329 }
 0x253   : > { %v320_v36 = vpop.f32.mrb[0].mxu0 }
 0x254   : > { %v331_v37 = vmul.f32 2.0, %v320_v36  ;;  %v1869_v38 = vpop.f32.mrb[1].mxu0 }
 0x255   : > { %v323_v40 = vpop.f32.mrb[2].mxu0 }
 0x256   : > { %v332_v41 = vsub.f32 %v330_v39, %v331_v37  ;;  %v1870_v42 = vpop.f32.mrb[3].mxu0 }
 0x258   : > { %v336_v43 = vsel %vm335_vm3, %v332_v41, inf }
 0x259   : > { %v337_v44 = vrot.slane %v336_v43, 4 }
 0x25b   : > { %v338_v45 = vmin.f32 %v336_v43, %v337_v44 }
 0x25d   : > { %v339_v46 = vrot.slane %v338_v45, 2 }
 0x25f   : > { %v340_v48 = vmin.f32 %v338_v45, %v339_v46 }
 0x261   : > { %v341_v49 = vrot.slane %v340_v48, 1 }
 0x263   : > { %v342_v51 = vmin.f32 %v340_v48, %v341_v49 }
 0x265   : > { %vm343_vm4 = vcmp.le.f32.partialorder %v332_v41, %v342_v51 }
 0x266   : > { %v344_v52 = vsel %vm343_vm4, %v2355_v50, 4 }
 0x267   : > { %v345_v53 = vsel %vm335_vm3, %v344_v52, 2147483647 }
 0x268   : > { %v346_v54 = vrot.slane %v345_v53, 4 }
 0x26a   : > { %vm347_vm5 = vcmp.lt.s32.totalorder %v345_v53, %v346_v54 }
 0x26b   : > { %v348_v55 = vsel %vm347_vm5, %v345_v53, %v346_v54 }
 0x26c   : > { %v349_v56 = vrot.slane %v348_v55, 2 }
 0x26e   : > { %vm350_vm6 = vcmp.lt.s32.totalorder %v348_v55, %v349_v56 }
 0x26f   : > { %v351_v57 = vsel %vm350_vm6, %v348_v55, %v349_v56 }
 0x270   : > { %v352_v58 = vrot.slane %v351_v57, 1 }
 0x272   : > { %vm353_vm7 = vcmp.lt.s32.totalorder %v351_v57, %v352_v58 }
 0x273   : > { %v354_v59 = vsel %vm353_vm7, %v351_v57, %v352_v58 }
 0x274   : > { %vm355_vm8 = vcmp.eq.s32.totalorder %v2355_v50, %v354_v59 }
 0x275   : > { %v1787_v60 = vsel %vm355_vm8, 1.0, %v2174_v14 }
 0x276   : > { %v404_v61 = vsel %vm335_vm3, %v1787_v60, 0.0  ;;  %v358_v62 = vpack.c.bf16 %v1787_v60, %v1787_v60 }
 0x277   : > { %405 = vadd.xlane.f32.xlu1 %v404_v61 }
 0x278   : > { %1874 = vmatmul.mubr.msk.bf16.vlgmr.msra.gmra.mrb[0].mxu1 %vm359_vm9, %v358_v62 }
 0x279   : > { %1878 = vmatpush3.bf16.xpose.msra.mxu1 %v2341_v34  ;;  %1879 = vmatprep.mubr.msk.bf16.mxu1 %vm2175_vm1, %v2174_v14 }
 0x27a   : > { %1889 = vmatprep.subr.bf16.mxu1 %v2174_v14 }
 0x304   : > { %v406_v63 = vpop.xlane.xlu1 %405 }
 0x305   : > { %v407_v0 = vmax.f32 %v406_v63, 1.0  ;;  %vm409_vm10 = vcmp.gt.f32.partialorder %v406_v63, 0.0 }
 0x307   : > { %2045 = vrcp.f32 %v407_v0 }
 0x311   : > { %v2046_v1 = vpop.eup %2045 }
 0x34b   : > { %v397_v2 = vpop.f32.mrb[0].mxu1 }
 0x34c   : > { %v410_v3 = vmul.f32 %v2046_v1, %v397_v2  ;;  %v1875_v4 = vpop.f32.mrb[1].mxu1 }
 0x34d   : > { %v400_v5 = vpop.f32.mrb[2].mxu1 }
 0x34e   : > { %v413_v6 = vsel %vm409_vm10, %v410_v3, %v2330_v28  ;;  %v1876_v7 = vpop.f32.mrb[3].mxu1 }
 0x34f   : > { %v414_v8 = vpack.c.bf16 %v413_v6, %v413_v6  ;;  %v458_v9 = vmul.f32 %v413_v6, %v413_v6 }
 0x351   : > { %1880 = vmatmul.mubr.msk.bf16.vlgmr.msra.gmra.mrb[4].mxu1 %vm232_vm0, %v414_v8  ;;  %v459_v10 = vsel %vm327_vm2, %v458_v9, 0.0 }
 0x352   : > { %1890 = vmatpush3.bf16.xpose.msra.mxu1 %v2341_v34  ;;  %460 = vadd.xlane.f32.xlu0 %v459_v10 }
 0x353   : > { %1891 = vmatprep.mubr.msk.bf16.mxu1 %vm2175_vm1, %v2174_v14  ;;  %1901 = vmatprep.subr.bf16.mxu1 %v2174_v14 }
 0x3df   : > { %v461_v15 = vpop.xlane.xlu0 %460 }
 0x424   : > { %v452_v11 = vpop.f32.mrb[4].mxu1 }
 0x425   : > { %v462_v12 = vmul.f32 2.0, %v452_v11  ;;  %v1881_v13 = vpop.f32.mrb[5].mxu1 }
 0x426   : > { %v455_v16 = vpop.f32.mrb[6].mxu1 }
 0x427   : > { %v463_v17 = vsub.f32 %v461_v15, %v462_v12  ;;  %v1882_v18 = vpop.f32.mrb[7].mxu1 }
 0x429   : > { %v464_v19 = vsel %vm335_vm3, %v463_v17, inf }
 0x42a   : > { %v465_v20 = vrot.slane %v464_v19, 4 }
 0x42c   : > { %v466_v21 = vmin.f32 %v464_v19, %v465_v20 }
 0x42e   : > { %v467_v22 = vrot.slane %v466_v21, 2 }
 0x430   : > { %v468_v23 = vmin.f32 %v466_v21, %v467_v22 }
 0x432   : > { %v469_v24 = vrot.slane %v468_v23, 1 }
 0x434   : > { %v470_v25 = vmin.f32 %v468_v23, %v469_v24 }
 0x436   : > { %vm471_vm11 = vcmp.le.f32.partialorder %v463_v17, %v470_v25 }
 0x437   : > { %v472_v26 = vsel %vm471_vm11, %v2355_v50, 4 }
 0x438   : > { %v473_v27 = vsel %vm335_vm3, %v472_v26, 2147483647 }
 0x439   : > { %v474_v28 = vrot.slane %v473_v27, 4 }
 0x43b   : > { %vm475_vm12 = vcmp.lt.s32.totalorder %v473_v27, %v474_v28 }
 0x43c   : > { %v476_v29 = vsel %vm475_vm12, %v473_v27, %v474_v28 }
 0x43d   : > { %v477_v30 = vrot.slane %v476_v29, 2 }
 0x43f   : > { %vm478_vm13 = vcmp.lt.s32.totalorder %v476_v29, %v477_v30 }
 0x440   : > { %v479_v31 = vsel %vm478_vm13, %v476_v29, %v477_v30 }
 0x441   : > { %v480_v32 = vrot.slane %v479_v31, 1 }
 0x443   : > { %vm481_vm14 = vcmp.lt.s32.totalorder %v479_v31, %v480_v32 }
 0x444   : > { %v482_v35 = vsel %vm481_vm14, %v479_v31, %v480_v32 }
 0x445   : > { %vm483_vm15 = vcmp.eq.s32.totalorder %v2355_v50, %v482_v35 }
 0x446   : > { %v1790_v36 = vsel %vm483_vm15, 1.0, %v2174_v14 }
 0x447   : > { %v531_v37 = vsel %vm335_vm3, %v1790_v36, 0.0  ;;  %v486_v38 = vpack.c.bf16 %v1790_v36, %v1790_v36 }
 0x448   : > { %532 = vadd.xlane.f32.xlu1 %v531_v37 }
 0x449   : > { %1886 = vmatmul.mubr.msk.bf16.vlgmr.msra.gmra.mrb[4].mxu0 %vm359_vm9, %v486_v38 }
 0x44a   : > { %1896 = vmatpush3.bf16.msra.mxu0 %v2336_v33  ;;  %1897 = vmatprep.mubr.msk.bf16.mxu0 %vm2175_vm1, %v2174_v14 }
 0x44b   : > { %1907 = vmatprep.subr.bf16.mxu0 %v2174_v14 }
 0x4d5   : > { %v533_v39 = vpop.xlane.xlu1 %532 }
 0x4d6   : > { %v534_v40 = vmax.f32 %v533_v39, 1.0  ;;  %vm536_vm4 = vcmp.gt.f32.partialorder %v533_v39, 0.0 }
 0x4d8   : > { %2047 = vrcp.f32 %v534_v40 }
 0x4e2   : > { %v2048_v41 = vpop.eup %2047 }
 0x51c   : > { %v524_v42 = vpop.f32.mrb[4].mxu0 }
 0x51d   : > { %v537_v43 = vmul.f32 %v2048_v41, %v524_v42  ;;  %v1887_v44 = vpop.f32.mrb[5].mxu0 }
 0x51e   : > { %v527_v45 = vpop.f32.mrb[6].mxu0 }
 0x51f   : > { %v540_v46 = vsel %vm536_vm4, %v537_v43, %v413_v6  ;;  %v1888_v48 = vpop.f32.mrb[7].mxu0 }
 0x520   : > { %v541_v49 = vpack.c.bf16 %v540_v46, %v540_v46  ;;  %v585_v51 = vmul.f32 %v540_v46, %v540_v46 }
 0x522   : > { %1892 = vmatmul.mubr.msk.bf16.vlgmr.msra.gmra.mrb[8].mxu1 %vm232_vm0, %v541_v49  ;;  %v586_v52 = vsel %vm327_vm2, %v585_v51, 0.0 }
 0x523   : > { %1902 = vmatpush3.bf16.xpose.msra.mxu1 %v2341_v34  ;;  %587 = vadd.xlane.f32.xlu0 %v586_v52 }
 0x524   : > { %1903 = vmatprep.mubr.msk.bf16.mxu1 %vm2175_vm1, %v2174_v14  ;;  %1913 = vmatprep.subr.bf16.mxu1 %v2174_v14 }
 0x5b0   : > { %v588_v56 = vpop.xlane.xlu0 %587 }
 0x5f5   : > { %v579_v53 = vpop.f32.mrb[8].mxu1 }
 0x5f6   : > { %v589_v54 = vmul.f32 2.0, %v579_v53  ;;  %v1893_v55 = vpop.f32.mrb[9].mxu1 }
 0x5f7   : > { %v582_v57 = vpop.f32.mrb[10].mxu1 }
 0x5f8   : > { %v590_v58 = vsub.f32 %v588_v56, %v589_v54  ;;  %v1894_v59 = vpop.f32.mrb[11].mxu1 }
 0x5fa   : > { %v591_v60 = vsel %vm335_vm3, %v590_v58, inf }
 0x5fb   : > { %v592_v61 = vrot.slane %v591_v60, 4 }
 0x5fd   : > { %v593_v62 = vmin.f32 %v591_v60, %v592_v61 }
 0x5ff   : > { %v594_v63 = vrot.slane %v593_v62, 2 }
 0x601   : > { %v595_v0 = vmin.f32 %v593_v62, %v594_v63 }
 0x603   : > { %v596_v1 = vrot.slane %v595_v0, 1 }
 0x605   : > { %v597_v2 = vmin.f32 %v595_v0, %v596_v1 }
 0x607   : > { %vm598_vm5 = vcmp.le.f32.partialorder %v590_v58, %v597_v2 }
 0x608   : > { %v599_v3 = vsel %vm598_vm5, %v2355_v50, 4 }
 0x609   : > { %v600_v4 = vsel %vm335_vm3, %v599_v3, 2147483647 }
 0x60a   : > { %v601_v5 = vrot.slane %v600_v4, 4 }
 0x60c   : > { %vm602_vm6 = vcmp.lt.s32.totalorder %v600_v4, %v601_v5 }
 0x60d   : > { %v603_v6 = vsel %vm602_vm6, %v600_v4, %v601_v5 }
 0x60e   : > { %v604_v7 = vrot.slane %v603_v6, 2 }
 0x610   : > { %vm605_vm7 = vcmp.lt.s32.totalorder %v603_v6, %v604_v7 }
 0x611   : > { %v606_v8 = vsel %vm605_vm7, %v603_v6, %v604_v7 }
 0x612   : > { %v607_v9 = vrot.slane %v606_v8, 1 }
 0x614   : > { %vm608_vm8 = vcmp.lt.s32.totalorder %v606_v8, %v607_v9 }
 0x615   : > { %v609_v10 = vsel %vm608_vm8, %v606_v8, %v607_v9 }
 0x616   : > { %vm610_vm10 = vcmp.eq.s32.totalorder %v2355_v50, %v609_v10 }
 0x617   : > { %v1793_v11 = vsel %vm610_vm10, 1.0, %v2174_v14 }
 0x618   : > { %v658_v12 = vsel %vm335_vm3, %v1793_v11, 0.0  ;;  %v613_v13 = vpack.c.bf16 %v1793_v11, %v1793_v11 }
 0x619   : > { %659 = vadd.xlane.f32.xlu1 %v658_v12 }
 0x61a   : > { %1898 = vmatmul.mubr.msk.bf16.vlgmr.msra.gmra.mrb[8].mxu0 %vm359_vm9, %v613_v13 }
 0x61b   : > { %1908 = vmatpush3.bf16.msra.mxu0 %v2336_v33  ;;  %1909 = vmatprep.mubr.msk.bf16.mxu0 %vm2175_vm1, %v2174_v14 }
 0x61c   : > { %1919 = vmatprep.subr.bf16.mxu0 %v2174_v14 }
 0x6a6   : > { %v660_v15 = vpop.xlane.xlu1 %659 }
 0x6a7   : > { %v661_v16 = vmax.f32 %v660_v15, 1.0  ;;  %vm663_vm11 = vcmp.gt.f32.partialorder %v660_v15, 0.0 }
 0x6a9   : > { %2049 = vrcp.f32 %v661_v16 }
 0x6b3   : > { %v2050_v17 = vpop.eup %2049 }
 0x6ed   : > { %v651_v18 = vpop.f32.mrb[8].mxu0 }
 0x6ee   : > { %v664_v19 = vmul.f32 %v2050_v17, %v651_v18  ;;  %v1899_v20 = vpop.f32.mrb[9].mxu0 }
 0x6ef   : > { %v654_v21 = vpop.f32.mrb[10].mxu0 }
 0x6f0   : > { %v667_v22 = vsel %vm663_vm11, %v664_v19, %v540_v46  ;;  %v1900_v23 = vpop.f32.mrb[11].mxu0 }
 0x6f1   : > { %v668_v24 = vpack.c.bf16 %v667_v22, %v667_v22  ;;  %v712_v25 = vmul.f32 %v667_v22, %v667_v22 }
 0x6f3   : > { %1904 = vmatmul.mubr.msk.bf16.vlgmr.msra.gmra.mrb[12].mxu1 %vm232_vm0, %v668_v24  ;;  %v713_v26 = vsel %vm327_vm2, %v712_v25, 0.0 }
 0x6f4   : > { %1914 = vmatpush3.bf16.xpose.msra.mxu1 %v2341_v34  ;;  %714 = vadd.xlane.f32.xlu0 %v713_v26 }
 0x6f5   : > { %1915 = vmatprep.mubr.msk.bf16.mxu1 %vm2175_vm1, %v2174_v14  ;;  %1925 = vmatprep.subr.bf16.mxu1 %v2174_v14 }
 0x781   : > { %v715_v30 = vpop.xlane.xlu0 %714 }
 0x7c6   : > { %v706_v27 = vpop.f32.mrb[12].mxu1 }
 0x7c7   : > { %v716_v28 = vmul.f32 2.0, %v706_v27  ;;  %v1905_v29 = vpop.f32.mrb[13].mxu1 }
 0x7c8   : > { %v709_v31 = vpop.f32.mrb[14].mxu1 }
 0x7c9   : > { %v717_v32 = vsub.f32 %v715_v30, %v716_v28  ;;  %v1906_v35 = vpop.f32.mrb[15].mxu1 }
 0x7cb   : > { %v718_v36 = vsel %vm335_vm3, %v717_v32, inf }
 0x7cc   : > { %v719_v37 = vrot.slane %v718_v36, 4 }
 0x7ce   : > { %v720_v38 = vmin.f32 %v718_v36, %v719_v37 }
 0x7d0   : > { %v721_v39 = vrot.slane %v720_v38, 2 }
 0x7d2   : > { %v722_v40 = vmin.f32 %v720_v38, %v721_v39 }
 0x7d4   : > { %v723_v41 = vrot.slane %v722_v40, 1 }
 0x7d6   : > { %v724_v42 = vmin.f32 %v722_v40, %v723_v41 }
 0x7d8   : > { %vm725_vm12 = vcmp.le.f32.partialorder %v717_v32, %v724_v42 }
 0x7d9   : > { %v726_v43 = vsel %vm725_vm12, %v2355_v50, 4 }
 0x7da   : > { %v727_v44 = vsel %vm335_vm3, %v726_v43, 2147483647 }
 0x7db   : > { %v728_v45 = vrot.slane %v727_v44, 4 }
 0x7dd   : > { %vm729_vm13 = vcmp.lt.s32.totalorder %v727_v44, %v728_v45 }
 0x7de   : > { %v730_v46 = vsel %vm729_vm13, %v727_v44, %v728_v45 }
 0x7df   : > { %v731_v48 = vrot.slane %v730_v46, 2 }
 0x7e1   : > { %vm732_vm14 = vcmp.lt.s32.totalorder %v730_v46, %v731_v48 }
 0x7e2   : > { %v733_v49 = vsel %vm732_vm14, %v730_v46, %v731_v48 }
 0x7e3   : > { %v734_v51 = vrot.slane %v733_v49, 1 }
 0x7e5   : > { %vm735_vm15 = vcmp.lt.s32.totalorder %v733_v49, %v734_v51 }
 0x7e6   : > { %v736_v52 = vsel %vm735_vm15, %v733_v49, %v734_v51 }
 0x7e7   : > { %vm737_vm4 = vcmp.eq.s32.totalorder %v2355_v50, %v736_v52 }
 0x7e8   : > { %v1796_v53 = vsel %vm737_vm4, 1.0, %v2174_v14 }
 0x7e9   : > { %v785_v54 = vsel %vm335_vm3, %v1796_v53, 0.0  ;;  %v740_v55 = vpack.c.bf16 %v1796_v53, %v1796_v53 }
 0x7ea   : > { %786 = vadd.xlane.f32.xlu1 %v785_v54 }
 0x7eb   : > { %1910 = vmatmul.mubr.msk.bf16.vlgmr.msra.gmra.mrb[12].mxu0 %vm359_vm9, %v740_v55 }
 0x7ec   : > { %1920 = vmatpush3.bf16.msra.mxu0 %v2336_v33  ;;  %1921 = vmatprep.mubr.msk.bf16.mxu0 %vm2175_vm1, %v2174_v14 }
 0x7ed   : > { %1931 = vmatprep.subr.bf16.mxu0 %v2174_v14 }
 0x877   : > { %v787_v56 = vpop.xlane.xlu1 %786 }
 0x878   : > { %v788_v57 = vmax.f32 %v787_v56, 1.0  ;;  %vm790_vm5 = vcmp.gt.f32.partialorder %v787_v56, 0.0 }
 0x87a   : > { %2051 = vrcp.f32 %v788_v57 }
 0x884   : > { %v2052_v58 = vpop.eup %2051 }
 0x8be   : > { %v778_v59 = vpop.f32.mrb[12].mxu0 }
 0x8bf   : > { %v791_v60 = vmul.f32 %v2052_v58, %v778_v59  ;;  %v1911_v61 = vpop.f32.mrb[13].mxu0 }
 0x8c0   : > { %v781_v62 = vpop.f32.mrb[14].mxu0 }
 0x8c1   : > { %v794_v63 = vsel %vm790_vm5, %v791_v60, %v667_v22  ;;  %v1912_v0 = vpop.f32.mrb[15].mxu0 }
 0x8c2   : > { %v795_v1 = vpack.c.bf16 %v794_v63, %v794_v63  ;;  %v839_v2 = vmul.f32 %v794_v63, %v794_v63 }
 0x8c4   : > { %1916 = vmatmul.mubr.msk.bf16.vlgmr.msra.gmra.mrb[16].mxu1 %vm232_vm0, %v795_v1  ;;  %v840_v3 = vsel %vm327_vm2, %v839_v2, 0.0 }
 0x8c5   : > { %1926 = vmatpush3.bf16.xpose.msra.mxu1 %v2341_v34  ;;  %841 = vadd.xlane.f32.xlu0 %v840_v3 }
 0x8c6   : > { %1927 = vmatprep.mubr.msk.bf16.mxu1 %vm2175_vm1, %v2174_v14  ;;  %1937 = vmatprep.subr.bf16.mxu1 %v2174_v14 }
 0x952   : > { %v842_v7 = vpop.xlane.xlu0 %841 }
 0x997   : > { %v833_v4 = vpop.f32.mrb[16].mxu1 }
 0x998   : > { %v843_v5 = vmul.f32 2.0, %v833_v4  ;;  %v1917_v6 = vpop.f32.mrb[17].mxu1 }
 0x999   : > { %v836_v8 = vpop.f32.mrb[18].mxu1 }
 0x99a   : > { %v844_v9 = vsub.f32 %v842_v7, %v843_v5  ;;  %v1918_v10 = vpop.f32.mrb[19].mxu1 }
 0x99c   : > { %v845_v11 = vsel %vm335_vm3, %v844_v9, inf }
 0x99d   : > { %v846_v12 = vrot.slane %v845_v11, 4 }
 0x99f   : > { %v847_v13 = vmin.f32 %v845_v11, %v846_v12 }
 0x9a1   : > { %v848_v15 = vrot.slane %v847_v13, 2 }
 0x9a3   : > { %v849_v16 = vmin.f32 %v847_v13, %v848_v15 }
 0x9a5   : > { %v850_v17 = vrot.slane %v849_v16, 1 }
 0x9a7   : > { %v851_v18 = vmin.f32 %v849_v16, %v850_v17 }
 0x9a9   : > { %vm852_vm6 = vcmp.le.f32.partialorder %v844_v9, %v851_v18 }
 0x9aa   : > { %v853_v19 = vsel %vm852_vm6, %v2355_v50, 4 }
 0x9ab   : > { %v854_v20 = vsel %vm335_vm3, %v853_v19, 2147483647 }
 0x9ac   : > { %v855_v21 = vrot.slane %v854_v20, 4 }
 0x9ae   : > { %vm856_vm7 = vcmp.lt.s32.totalorder %v854_v20, %v855_v21 }
 0x9af   : > { %v857_v22 = vsel %vm856_vm7, %v854_v20, %v855_v21 }
 0x9b0   : > { %v858_v23 = vrot.slane %v857_v22, 2 }
 0x9b2   : > { %vm859_vm8 = vcmp.lt.s32.totalorder %v857_v22, %v858_v23 }
 0x9b3   : > { %v860_v24 = vsel %vm859_vm8, %v857_v22, %v858_v23 }
 0x9b4   : > { %v861_v25 = vrot.slane %v860_v24, 1 }
 0x9b6   : > { %vm862_vm10 = vcmp.lt.s32.totalorder %v860_v24, %v861_v25 }
 0x9b7   : > { %v863_v26 = vsel %vm862_vm10, %v860_v24, %v861_v25 }
 0x9b8   : > { %vm864_vm11 = vcmp.eq.s32.totalorder %v2355_v50, %v863_v26 }
 0x9b9   : > { %v1799_v27 = vsel %vm864_vm11, 1.0, %v2174_v14 }
 0x9ba   : > { %v912_v28 = vsel %vm335_vm3, %v1799_v27, 0.0  ;;  %v867_v29 = vpack.c.bf16 %v1799_v27, %v1799_v27 }
 0x9bb   : > { %913 = vadd.xlane.f32.xlu1 %v912_v28 }
 0x9bc   : > { %1922 = vmatmul.mubr.msk.bf16.vlgmr.msra.gmra.mrb[16].mxu0 %vm359_vm9, %v867_v29 }
 0x9bd   : > { %1932 = vmatpush3.bf16.msra.mxu0 %v2336_v33  ;;  %1933 = vmatprep.mubr.msk.bf16.mxu0 %vm2175_vm1, %v2174_v14 }
 0x9be   : > { %1943 = vmatprep.subr.bf16.mxu0 %v2174_v14 }
 0xa48   : > { %v914_v30 = vpop.xlane.xlu1 %913 }
 0xa49   : > { %v915_v31 = vmax.f32 %v914_v30, 1.0  ;;  %vm917_vm12 = vcmp.gt.f32.partialorder %v914_v30, 0.0 }
 0xa4b   : > { %2053 = vrcp.f32 %v915_v31 }
 0xa55   : > { %v2054_v32 = vpop.eup %2053 }
 0xa8f   : > { %v905_v35 = vpop.f32.mrb[16].mxu0 }
 0xa90   : > { %v918_v36 = vmul.f32 %v2054_v32, %v905_v35  ;;  %v1923_v37 = vpop.f32.mrb[17].mxu0 }
 0xa91   : > { %v908_v38 = vpop.f32.mrb[18].mxu0 }
 0xa92   : > { %v921_v39 = vsel %vm917_vm12, %v918_v36, %v794_v63  ;;  %v1924_v40 = vpop.f32.mrb[19].mxu0 }
 0xa93   : > { %v922_v41 = vpack.c.bf16 %v921_v39, %v921_v39  ;;  %v966_v42 = vmul.f32 %v921_v39, %v921_v39 }
 0xa95   : > { %1928 = vmatmul.mubr.msk.bf16.vlgmr.msra.gmra.mrb[20].mxu1 %vm232_vm0, %v922_v41  ;;  %v967_v43 = vsel %vm327_vm2, %v966_v42, 0.0 }
 0xa96   : > { %1938 = vmatpush3.bf16.xpose.msra.mxu1 %v2341_v34  ;;  %968 = vadd.xlane.f32.xlu0 %v967_v43 }
 0xa97   : > { %1939 = vmatprep.mubr.msk.bf16.mxu1 %vm2175_vm1, %v2174_v14  ;;  %1949 = vmatprep.subr.bf16.mxu1 %v2174_v14 }
 0xb23   : > { %v969_v48 = vpop.xlane.xlu0 %968 }
 0xb68   : > { %v960_v44 = vpop.f32.mrb[20].mxu1 }
 0xb69   : > { %v970_v45 = vmul.f32 2.0, %v960_v44  ;;  %v1929_v46 = vpop.f32.mrb[21].mxu1 }
 0xb6a   : > { %v963_v49 = vpop.f32.mrb[22].mxu1 }
 0xb6b   : > { %v971_v51 = vsub.f32 %v969_v48, %v970_v45  ;;  %v1930_v52 = vpop.f32.mrb[23].mxu1 }
 0xb6d   : > { %v972_v53 = vsel %vm335_vm3, %v971_v51, inf }
 0xb6e   : > { %v973_v54 = vrot.slane %v972_v53, 4 }
 0xb70   : > { %v974_v55 = vmin.f32 %v972_v53, %v973_v54 }
 0xb72   : > { %v975_v56 = vrot.slane %v974_v55, 2 }
 0xb74   : > { %v976_v57 = vmin.f32 %v974_v55, %v975_v56 }
 0xb76   : > { %v977_v58 = vrot.slane %v976_v57, 1 }
 0xb78   : > { %v978_v59 = vmin.f32 %v976_v57, %v977_v58 }
 0xb7a   : > { %vm979_vm13 = vcmp.le.f32.partialorder %v971_v51, %v978_v59 }
 0xb7b   : > { %v980_v60 = vsel %vm979_vm13, %v2355_v50, 4 }
 0xb7c   : > { %v981_v61 = vsel %vm335_vm3, %v980_v60, 2147483647 }
 0xb7d   : > { %v982_v62 = vrot.slane %v981_v61, 4 }
 0xb7f   : > { %vm983_vm14 = vcmp.lt.s32.totalorder %v981_v61, %v982_v62 }
 0xb80   : > { %v984_v63 = vsel %vm983_vm14, %v981_v61, %v982_v62 }
 0xb81   : > { %v985_v0 = vrot.slane %v984_v63, 2 }
 0xb83   : > { %vm986_vm15 = vcmp.lt.s32.totalorder %v984_v63, %v985_v0 }
 0xb84   : > { %v987_v1 = vsel %vm986_vm15, %v984_v63, %v985_v0 }
 0xb85   : > { %v988_v2 = vrot.slane %v987_v1, 1 }
 0xb87   : > { %vm989_vm4 = vcmp.lt.s32.totalorder %v987_v1, %v988_v2 }
 0xb88   : > { %v990_v3 = vsel %vm989_vm4, %v987_v1, %v988_v2 }
 0xb89   : > { %vm991_vm5 = vcmp.eq.s32.totalorder %v2355_v50, %v990_v3 }
 0xb8a   : > { %v1802_v4 = vsel %vm991_vm5, 1.0, %v2174_v14 }
 0xb8b   : > { %v1039_v5 = vsel %vm335_vm3, %v1802_v4, 0.0  ;;  %v994_v6 = vpack.c.bf16 %v1802_v4, %v1802_v4 }
 0xb8c   : > { %1040 = vadd.xlane.f32.xlu1 %v1039_v5 }
 0xb8d   : > { %1934 = vmatmul.mubr.msk.bf16.vlgmr.msra.gmra.mrb[20].mxu0 %vm359_vm9, %v994_v6 }
 0xb8e   : > { %1944 = vmatpush3.bf16.msra.mxu0 %v2336_v33  ;;  %1945 = vmatprep.mubr.msk.bf16.mxu0 %vm2175_vm1, %v2174_v14 }
 0xb8f   : > { %1955 = vmatprep.subr.bf16.mxu0 %v2174_v14 }
 0xc19   : > { %v1041_v7 = vpop.xlane.xlu1 %1040 }
 0xc1a   : > { %v1042_v8 = vmax.f32 %v1041_v7, 1.0  ;;  %vm1044_vm6 = vcmp.gt.f32.partialorder %v1041_v7, 0.0 }
 0xc1c   : > { %2055 = vrcp.f32 %v1042_v8 }
 0xc26   : > { %v2056_v9 = vpop.eup %2055 }
 0xc60   : > { %v1032_v10 = vpop.f32.mrb[20].mxu0 }
 0xc61   : > { %v1045_v11 = vmul.f32 %v2056_v9, %v1032_v10  ;;  %v1935_v12 = vpop.f32.mrb[21].mxu0 }
 0xc62   : > { %v1035_v13 = vpop.f32.mrb[22].mxu0 }
 0xc63   : > { %v1048_v15 = vsel %vm1044_vm6, %v1045_v11, %v921_v39  ;;  %v1936_v16 = vpop.f32.mrb[23].mxu0 }
 0xc64   : > { %v1049_v17 = vpack.c.bf16 %v1048_v15, %v1048_v15  ;;  %v1093_v18 = vmul.f32 %v1048_v15, %v1048_v15 }
 0xc66   : > { %1940 = vmatmul.mubr.msk.bf16.vlgmr.msra.gmra.mrb[24].mxu1 %vm232_vm0, %v1049_v17  ;;  %v1094_v19 = vsel %vm327_vm2, %v1093_v18, 0.0 }
 0xc67   : > { %1950 = vmatpush3.bf16.xpose.msra.mxu1 %v2341_v34  ;;  %1095 = vadd.xlane.f32.xlu0 %v1094_v19 }
 0xc68   : > { %1951 = vmatprep.mubr.msk.bf16.mxu1 %vm2175_vm1, %v2174_v14  ;;  %1961 = vmatprep.subr.bf16.mxu1 %v2174_v14 }
 0xcf4   : > { %v1096_v23 = vpop.xlane.xlu0 %1095 }
 0xd39   : > { %v1087_v20 = vpop.f32.mrb[24].mxu1 }
 0xd3a   : > { %v1097_v21 = vmul.f32 2.0, %v1087_v20  ;;  %v1941_v22 = vpop.f32.mrb[25].mxu1 }
 0xd3b   : > { %v1090_v24 = vpop.f32.mrb[26].mxu1 }
 0xd3c   : > { %v1098_v25 = vsub.f32 %v1096_v23, %v1097_v21  ;;  %v1942_v26 = vpop.f32.mrb[27].mxu1 }
 0xd3e   : > { %v1099_v27 = vsel %vm335_vm3, %v1098_v25, inf }
 0xd3f   : > { %v1100_v28 = vrot.slane %v1099_v27, 4 }
 0xd41   : > { %v1101_v29 = vmin.f32 %v1099_v27, %v1100_v28 }
 0xd43   : > { %v1102_v30 = vrot.slane %v1101_v29, 2 }
 0xd45   : > { %v1103_v31 = vmin.f32 %v1101_v29, %v1102_v30 }
 0xd47   : > { %v1104_v32 = vrot.slane %v1103_v31, 1 }
 0xd49   : > { %v1105_v35 = vmin.f32 %v1103_v31, %v1104_v32 }
 0xd4b   : > { %vm1106_vm7 = vcmp.le.f32.partialorder %v1098_v25, %v1105_v35 }
 0xd4c   : > { %v1107_v36 = vsel %vm1106_vm7, %v2355_v50, 4 }
 0xd4d   : > { %v1108_v37 = vsel %vm335_vm3, %v1107_v36, 2147483647 }
 0xd4e   : > { %v1109_v38 = vrot.slane %v1108_v37, 4 }
 0xd50   : > { %vm1110_vm8 = vcmp.lt.s32.totalorder %v1108_v37, %v1109_v38 }
 0xd51   : > { %v1111_v39 = vsel %vm1110_vm8, %v1108_v37, %v1109_v38 }
 0xd52   : > { %v1112_v40 = vrot.slane %v1111_v39, 2 }
 0xd54   : > { %vm1113_vm10 = vcmp.lt.s32.totalorder %v1111_v39, %v1112_v40 }
 0xd55   : > { %v1114_v41 = vsel %vm1113_vm10, %v1111_v39, %v1112_v40 }
 0xd56   : > { %v1115_v42 = vrot.slane %v1114_v41, 1 }
 0xd58   : > { %vm1116_vm11 = vcmp.lt.s32.totalorder %v1114_v41, %v1115_v42 }
 0xd59   : > { %v1117_v43 = vsel %vm1116_vm11, %v1114_v41, %v1115_v42 }
 0xd5a   : > { %vm1118_vm12 = vcmp.eq.s32.totalorder %v2355_v50, %v1117_v43 }
 0xd5b   : > { %v1805_v44 = vsel %vm1118_vm12, 1.0, %v2174_v14 }
 0xd5c   : > { %v1166_v45 = vsel %vm335_vm3, %v1805_v44, 0.0  ;;  %v1121_v46 = vpack.c.bf16 %v1805_v44, %v1805_v44 }
 0xd5d   : > { %1167 = vadd.xlane.f32.xlu1 %v1166_v45 }
 0xd5e   : > { %1946 = vmatmul.mubr.msk.bf16.vlgmr.msra.gmra.mrb[24].mxu0 %vm359_vm9, %v1121_v46 }
 0xd5f   : > { %1956 = vmatpush3.bf16.msra.mxu0 %v2336_v33  ;;  %1957 = vmatprep.mubr.msk.bf16.mxu0 %vm2175_vm1, %v2174_v14 }
 0xd60   : > { %1967 = vmatprep.subr.bf16.mxu0 %v2174_v14 }
 0xdea   : > { %v1168_v48 = vpop.xlane.xlu1 %1167 }
 0xdeb   : > { %v1169_v49 = vmax.f32 %v1168_v48, 1.0  ;;  %vm1171_vm13 = vcmp.gt.f32.partialorder %v1168_v48, 0.0 }
 0xded   : > { %2057 = vrcp.f32 %v1169_v49 }
 0xdf7   : > { %v2058_v51 = vpop.eup %2057 }
 0xe31   : > { %v1159_v52 = vpop.f32.mrb[24].mxu0 }
 0xe32   : > { %v1172_v53 = vmul.f32 %v2058_v51, %v1159_v52  ;;  %v1947_v54 = vpop.f32.mrb[25].mxu0 }
 0xe33   : > { %v1162_v55 = vpop.f32.mrb[26].mxu0 }
 0xe34   : > { %v1175_v56 = vsel %vm1171_vm13, %v1172_v53, %v1048_v15  ;;  %v1948_v57 = vpop.f32.mrb[27].mxu0 }
 0xe35   : > { %v1176_v58 = vpack.c.bf16 %v1175_v56, %v1175_v56  ;;  %v1220_v59 = vmul.f32 %v1175_v56, %v1175_v56 }
 0xe37   : > { %1952 = vmatmul.mubr.msk.bf16.vlgmr.msra.gmra.mrb[28].mxu1 %vm232_vm0, %v1176_v58  ;;  %v1221_v60 = vsel %vm327_vm2, %v1220_v59, 0.0 }
 0xe38   : > { %1962 = vmatpush3.bf16.xpose.msra.mxu1 %v2341_v34  ;;  %1222 = vadd.xlane.f32.xlu0 %v1221_v60 }
 0xe39   : > { %1963 = vmatprep.mubr.msk.bf16.mxu1 %vm2175_vm1, %v2174_v14  ;;  %1973 = vmatprep.subr.bf16.mxu1 %v2174_v14 }
 0xec5   : > { %v1223_v0 = vpop.xlane.xlu0 %1222 }
 0xf0a   : > { %v1214_v61 = vpop.f32.mrb[28].mxu1 }
 0xf0b   : > { %v1224_v62 = vmul.f32 2.0, %v1214_v61  ;;  %v1953_v63 = vpop.f32.mrb[29].mxu1 }
 0xf0c   : > { %v1217_v1 = vpop.f32.mrb[30].mxu1 }
 0xf0d   : > { %v1225_v2 = vsub.f32 %v1223_v0, %v1224_v62  ;;  %v1954_v3 = vpop.f32.mrb[31].mxu1 }
 0xf0f   : > { %v1226_v4 = vsel %vm335_vm3, %v1225_v2, inf }
 0xf10   : > { %v1227_v5 = vrot.slane %v1226_v4, 4 }
 0xf12   : > { %v1228_v6 = vmin.f32 %v1226_v4, %v1227_v5 }
 0xf14   : > { %v1229_v7 = vrot.slane %v1228_v6, 2 }
 0xf16   : > { %v1230_v8 = vmin.f32 %v1228_v6, %v1229_v7 }
 0xf18   : > { %v1231_v9 = vrot.slane %v1230_v8, 1 }
 0xf1a   : > { %v1232_v10 = vmin.f32 %v1230_v8, %v1231_v9 }
 0xf1c   : > { %vm1233_vm14 = vcmp.le.f32.partialorder %v1225_v2, %v1232_v10 }
 0xf1d   : > { %v1234_v11 = vsel %vm1233_vm14, %v2355_v50, 4 }
 0xf1e   : > { %v1235_v12 = vsel %vm335_vm3, %v1234_v11, 2147483647 }
 0xf1f   : > { %v1236_v13 = vrot.slane %v1235_v12, 4 }
 0xf21   : > { %vm1237_vm15 = vcmp.lt.s32.totalorder %v1235_v12, %v1236_v13 }
 0xf22   : > { %v1238_v15 = vsel %vm1237_vm15, %v1235_v12, %v1236_v13 }
 0xf23   : > { %v1239_v16 = vrot.slane %v1238_v15, 2 }
 0xf25   : > { %vm1240_vm4 = vcmp.lt.s32.totalorder %v1238_v15, %v1239_v16 }
 0xf26   : > { %v1241_v17 = vsel %vm1240_vm4, %v1238_v15, %v1239_v16 }
 0xf27   : > { %v1242_v18 = vrot.slane %v1241_v17, 1 }
 0xf29   : > { %vm1243_vm5 = vcmp.lt.s32.totalorder %v1241_v17, %v1242_v18 }
 0xf2a   : > { %v1244_v19 = vsel %vm1243_vm5, %v1241_v17, %v1242_v18 }
 0xf2b   : > { %vm1245_vm6 = vcmp.eq.s32.totalorder %v2355_v50, %v1244_v19 }
 0xf2c   : > { %v1808_v20 = vsel %vm1245_vm6, 1.0, %v2174_v14 }
 0xf2d   : > { %v1293_v21 = vsel %vm335_vm3, %v1808_v20, 0.0  ;;  %v1248_v22 = vpack.c.bf16 %v1808_v20, %v1808_v20 }
 0xf2e   : > { %1294 = vadd.xlane.f32.xlu1 %v1293_v21 }
 0xf2f   : > { %1958 = vmatmul.mubr.msk.bf16.vlgmr.msra.gmra.mrb[28].mxu0 %vm359_vm9, %v1248_v22 }
 0xf30   : > { %1968 = vmatpush3.bf16.msra.mxu0 %v2336_v33  ;;  %1969 = vmatprep.mubr.msk.bf16.mxu0 %vm2175_vm1, %v2174_v14 }
 0xf31   : > { %1979 = vmatprep.subr.bf16.mxu0 %v2174_v14 }
 0xfbb   : > { %v1295_v23 = vpop.xlane.xlu1 %1294 }
 0xfbc   : > { %v1296_v24 = vmax.f32 %v1295_v23, 1.0  ;;  %vm1298_vm7 = vcmp.gt.f32.partialorder %v1295_v23, 0.0 }
 0xfbe   : > { %2059 = vrcp.f32 %v1296_v24 }
 0xfc8   : > { %v2060_v25 = vpop.eup %2059 }
0x1002   : > { %v1286_v26 = vpop.f32.mrb[28].mxu0 }
0x1003   : > { %v1299_v27 = vmul.f32 %v2060_v25, %v1286_v26  ;;  %v1959_v28 = vpop.f32.mrb[29].mxu0 }
0x1004   : > { %v1289_v29 = vpop.f32.mrb[30].mxu0 }
0x1005   : > { %v1302_v30 = vsel %vm1298_vm7, %v1299_v27, %v1175_v56  ;;  %v1960_v31 = vpop.f32.mrb[31].mxu0 }
0x1006   : > { %v1303_v32 = vpack.c.bf16 %v1302_v30, %v1302_v30  ;;  %v1347_v35 = vmul.f32 %v1302_v30, %v1302_v30 }
0x1008   : > { %1964 = vmatmul.mubr.msk.bf16.vlgmr.msra.gmra.mrb[32].mxu1 %vm232_vm0, %v1303_v32  ;;  %v1348_v36 = vsel %vm327_vm2, %v1347_v35, 0.0 }
0x1009   : > { %1974 = vmatpush3.bf16.xpose.msra.mxu1 %v2341_v34  ;;  %1349 = vadd.xlane.f32.xlu0 %v1348_v36 }
0x100a   : > { %1975 = vmatprep.mubr.msk.bf16.mxu1 %vm2175_vm1, %v2174_v14  ;;  %1985 = vmatprep.subr.bf16.mxu1 %v2174_v14 }
0x1096   : > { %v1350_v40 = vpop.xlane.xlu0 %1349 }
0x10db   : > { %v1341_v37 = vpop.f32.mrb[32].mxu1 }
0x10dc   : > { %v1351_v38 = vmul.f32 2.0, %v1341_v37  ;;  %v1965_v39 = vpop.f32.mrb[33].mxu1 }
0x10dd   : > { %v1344_v41 = vpop.f32.mrb[34].mxu1 }
0x10de   : > { %v1352_v42 = vsub.f32 %v1350_v40, %v1351_v38  ;;  %v1966_v43 = vpop.f32.mrb[35].mxu1 }
0x10e0   : > { %v1353_v44 = vsel %vm335_vm3, %v1352_v42, inf }
0x10e1   : > { %v1354_v45 = vrot.slane %v1353_v44, 4 }
0x10e3   : > { %v1355_v46 = vmin.f32 %v1353_v44, %v1354_v45 }
0x10e5   : > { %v1356_v48 = vrot.slane %v1355_v46, 2 }
0x10e7   : > { %v1357_v49 = vmin.f32 %v1355_v46, %v1356_v48 }
0x10e9   : > { %v1358_v34 = vrot.slane %v1357_v49, 1 }
0x10eb   : > { %v1359_v51 = vmin.f32 %v1357_v49, %v1358_v34 }
0x10ed   : > { %vm1360_vm8 = vcmp.le.f32.partialorder %v1352_v42, %v1359_v51 }
0x10ee   : > { %v1361_v52 = vsel %vm1360_vm8, %v2355_v50, 4 }
0x10ef   : > { %v1362_v53 = vsel %vm335_vm3, %v1361_v52, 2147483647  ;;  %v1610_v52 = vand.u32 127, %v333_v47 }
0x10f0   : > { %v1363_v54 = vrot.slane %v1362_v53, 4 }
0x10f2   : > { %vm1364_vm10 = vcmp.lt.s32.totalorder %v1362_v53, %v1363_v54 }
0x10f3   : > { %v1365_v55 = vsel %vm1364_vm10, %v1362_v53, %v1363_v54  ;;  %v1613_v53 = vsub.s32 %v1610_v52, %v2355_v50 }
0x10f4   : > { %v1366_v56 = vrot.slane %v1365_v55, 2 }
0x10f6   : > { %vm1367_vm11 = vcmp.lt.s32.totalorder %v1365_v55, %v1366_v56 }
0x10f7   : > { %v1368_v57 = vsel %vm1367_vm11, %v1365_v55, %v1366_v56 }
0x10f8   : > { %v1369_v58 = vrot.slane %v1368_v57, 1 }
0x10fa   : > { %vm1370_vm12 = vcmp.lt.s32.totalorder %v1368_v57, %v1369_v58 }
0x10fb   : > { %v1371_v59 = vsel %vm1370_vm12, %v1368_v57, %v1369_v58 }
0x10fc   : > { %vm1372_vm13 = vcmp.eq.s32.totalorder %v2355_v50, %v1371_v59 }
0x10fd   : > { %v1811_v60 = vsel %vm1372_vm13, 1.0, %v2174_v14 }
0x10fe   : > { %v1420_v61 = vsel %vm335_vm3, %v1811_v60, 0.0  ;;  %v1375_v62 = vpack.c.bf16 %v1811_v60, %v1811_v60 }
0x10ff   : > { %1421 = vadd.xlane.f32.xlu1 %v1420_v61 }
0x1100   : > { %1970 = vmatmul.mubr.msk.bf16.vlgmr.msra.gmra.mrb[32].mxu0 %vm359_vm9, %v1375_v62 }
0x1101   : > { %1980 = vmatpush3.bf16.msra.mxu0 %v2336_v33  ;;  %1981 = vmatprep.mubr.msk.bf16.mxu0 %vm2175_vm1, %v2174_v14 }
0x118c   : > { %v1422_v63 = vpop.xlane.xlu1 %1421 }
0x118d   : > { %v1423_v0 = vmax.f32 %v1422_v63, 1.0  ;;  %vm1425_vm14 = vcmp.gt.f32.partialorder %v1422_v63, 0.0 }
0x118f   : > { %2061 = vrcp.f32 %v1423_v0 }
0x1199   : > { %v2062_v1 = vpop.eup %2061 }
0x11d3   : > { %v1413_v2 = vpop.f32.mrb[32].mxu0 }
0x11d4   : > { %v1426_v3 = vmul.f32 %v2062_v1, %v1413_v2  ;;  %v1971_v4 = vpop.f32.mrb[33].mxu0 }
0x11d5   : > { %v1416_v5 = vpop.f32.mrb[34].mxu0 }
0x11d6   : > { %v1429_v6 = vsel %vm1425_vm14, %v1426_v3, %v1302_v30  ;;  %v1972_v7 = vpop.f32.mrb[35].mxu0 }
0x11d7   : > { %v1430_v8 = vpack.c.bf16 %v1429_v6, %v1429_v6  ;;  %v1474_v9 = vmul.f32 %v1429_v6, %v1429_v6 }
0x11d9   : > { %1976 = vmatmul.mubr.msk.bf16.vlgmr.msra.gmra.mrb[36].mxu1 %vm232_vm0, %v1430_v8  ;;  %v1475_v10 = vsel %vm327_vm2, %v1474_v9, 0.0 }
0x11da   : > { %1476 = vadd.xlane.f32.xlu0 %v1475_v10  ;;  %1987 = vmatprep.mubr.msk.bf16.mxu1 %vm2175_vm1, %v2174_v14 }
0x1267   : > { %v1477_v15 = vpop.xlane.xlu0 %1476 }
0x12ac   : > { %v1468_v11 = vpop.f32.mrb[36].mxu1 }
0x12ad   : > { %v1478_v12 = vmul.f32 2.0, %v1468_v11  ;;  %v1977_v13 = vpop.f32.mrb[37].mxu1 }
0x12ae   : > { %v1471_v16 = vpop.f32.mrb[38].mxu1 }
0x12af   : > { %v1479_v17 = vsub.f32 %v1477_v15, %v1478_v12  ;;  %v1978_v18 = vpop.f32.mrb[39].mxu1 }
0x12b1   : > { %v1480_v19 = vsel %vm335_vm3, %v1479_v17, inf }
0x12b2   : > { %v1481_v20 = vrot.slane %v1480_v19, 4 }
0x12b4   : > { %v1482_v21 = vmin.f32 %v1480_v19, %v1481_v20 }
0x12b6   : > { %v1483_v22 = vrot.slane %v1482_v21, 2 }
0x12b8   : > { %v1484_v23 = vmin.f32 %v1482_v21, %v1483_v22 }
0x12ba   : > { %v1485_v24 = vrot.slane %v1484_v23, 1 }
0x12bc   : > { %v1486_v25 = vmin.f32 %v1484_v23, %v1485_v24 }
0x12be   : > { %vm1487_vm15 = vcmp.le.f32.partialorder %v1479_v17, %v1486_v25 }
0x12bf   : > { %v1488_v26 = vsel %vm1487_vm15, %v2355_v50, 4 }
0x12c0   : > { %v1489_v27 = vsel %vm335_vm3, %v1488_v26, 2147483647 }
0x12c1   : > { %v1490_v28 = vrot.slane %v1489_v27, 4 }
0x12c3   : > { %vm1491_vm1 = vcmp.lt.s32.totalorder %v1489_v27, %v1490_v28 }
0x12c4   : > { %v1492_v29 = vsel %vm1491_vm1, %v1489_v27, %v1490_v28 }
0x12c5   : > { %v1493_v30 = vrot.slane %v1492_v29, 2 }
0x12c7   : > { %vm1494_vm4 = vcmp.lt.s32.totalorder %v1492_v29, %v1493_v30 }
0x12c8   : > { %v1495_v31 = vsel %vm1494_vm4, %v1492_v29, %v1493_v30 }
0x12c9   : > { %v1496_v32 = vrot.slane %v1495_v31, 1 }
0x12cb   : > { %vm1497_vm5 = vcmp.lt.s32.totalorder %v1495_v31, %v1496_v32 }
0x12cc   : > { %v1498_v35 = vsel %vm1497_vm5, %v1495_v31, %v1496_v32 }
0x12cd   : > { %vm1499_vm6 = vcmp.eq.s32.totalorder %v2355_v50, %v1498_v35 }
0x12ce   : > { %v1814_v36 = vsel %vm1499_vm6, 1.0, %v2174_v14 }
0x12cf   : > { %v1547_v37 = vsel %vm335_vm3, %v1814_v36, 0.0  ;;  %v1502_v38 = vpack.c.bf16 %v1814_v36, %v1814_v36  ;;  %vm1630_vm3 = vcmask 31744  }
0x12d0   : > { %1548 = vadd.xlane.f32.xlu1 %v1547_v37 }
0x12d1   : > { %1982 = vmatmul.mubr.msk.bf16.vlgmr.msra.gmra.mrb[36].mxu0 %vm359_vm9, %v1502_v38 }
0x135d   : > { %v1549_v39 = vpop.xlane.xlu1 %1548 }
0x135e   : > { %v1550_v40 = vmax.f32 %v1549_v39, 1.0  ;;  %vm1552_vm7 = vcmp.gt.f32.partialorder %v1549_v39, 0.0 }
0x1360   : > { %2063 = vrcp.f32 %v1550_v40 }
0x136a   : > { %v2064_v41 = vpop.eup %2063 }
0x13a4   : > { %v1540_v42 = vpop.f32.mrb[36].mxu0 }
0x13a5   : > { %v1553_v43 = vmul.f32 %v2064_v41, %v1540_v42  ;;  %v1983_v44 = vpop.f32.mrb[37].mxu0 }
0x13a6   : > { %v1543_v45 = vpop.f32.mrb[38].mxu0 }
0x13a7   : > { %v1984_v46 = vpop.f32.mrb[39].mxu0  ;;  %v1556_v48 = vsel %vm1552_vm7, %v1553_v43, %v1429_v6 }
0x13a8   : > { %v1602_v49 = vmul.f32 %v1556_v48, %v1556_v48  ;;  %v1557_v14 = vpack.c.bf16 %v1556_v48, %v1556_v48  ;;  %1653 = vst.msk [vmem:[%s2515_s23] sm:$0xf] %vm327_vm2, %v1556_v48 }
0x13aa   : > { %v1603_v34 = vsel %vm327_vm2, %v1602_v49, 0.0  ;;  %v1559_v51 = vsel %vm232_vm0, %v1557_v14, 0 }
0x13ab   : > { %1604 = vadd.xlane.f32.xlu0 %v1603_v34  ;;  %1986 = vmatpush3.bf16.xpose.msra.mxu1 %v1559_v51 }
0x13b2   : > { %1988 = vmatmul.mubr.msk.bf16.vlgmr.msra.gmra.mrb[40].mxu1 %vm232_vm0, %v2336_v33 }
0x1438   : > { %v1605_v54 = vpop.xlane.xlu0 %1604 }
0x1439   : > { %v1614_v56 = vrot.slane %v1605_v54, %v1613_v53 }
0x1485   : > { %v1595_v55 = vpop.f32.mrb[40].mxu1 }
0x1486   : > { %v1606_v57 = vmul.f32 2.0, %v1595_v55  ;;  %v1989_v58 = vpop.f32.mrb[41].mxu1 }
0x1487   : > { %v1598_v59 = vpop.f32.mrb[42].mxu1 }
0x1488   : > { %v1607_v60 = vmul.f32 2.0, %v1598_v59  ;;  %v1990_v61 = vpop.f32.mrb[43].mxu1  ;;  %v1628_v62 = vsub.f32 %v1606_v57, %v1614_v56 }
0x148a   : > { %v1631_v63 = vsel %vm1630_vm3, %v1628_v62, -inf  ;;  %v1629_v0 = vsub.f32 %v1607_v60, %v1614_v56 }
0x148b   : > { %1632 = vmax.xlane.f32.xlu1 %v1631_v63 }
0x148c   : > { %v1634_v33 = vsel %vm1630_vm3, %v1629_v0, -inf }
0x148d   : > { %1635 = vmax.xlane.f32.xlu0 %v1634_v33 }
0x1518   : > { %v1633_v47 = vpop.xlane.xlu1 %1632 }
0x1519   : > { %v1637_v50 = vsub.f32 %v1628_v62, %v1633_v47 }
0x151a   : > { %v1636_v1 = vpop.xlane.xlu0 %1635 }
0x151b   : > { %v1639_v2 = vmul.f32 1.442695, %v1637_v50  ;;  %v1638_v3 = vsub.f32 %v1629_v0, %v1636_v1 }
0x151d   : > { %2065 = vpow2.f32 %v1639_v2  ;;  %v1641_v4 = vmul.f32 1.442695, %v1638_v3 }
0x151f   : > { %2067 = vpow2.f32 %v1641_v4 }
0x1527   : > { %v2066_v5 = vpop.eup %2065 }
0x1528   : > { %v1643_v6 = vsel %vm1630_vm3, %v2066_v5, 0.0 }
0x1529   : > { %v2068_v7 = vpop.eup %2067  ;;  %1644 = vadd.xlane.f32.xlu1 %v1643_v6 }
0x152a   : > { %v1646_v8 = vsel %vm1630_vm3, %v2068_v7, 0.0 }
0x152b   : > { %1647 = vadd.xlane.f32.xlu0 %v1646_v8 }
0x152c   : > { %2116 = shalt.err (!%p2113_p2)
}
0x152d   : > { %s2117_s13 = scalar_lea.hbm %s2534_s6, 64  ;;  %s2121_s10 = scalar_lea.hbm %s2582_s3, 128 }
0x152e   : > { %p2118_p4 = scmp.ne.s32.totalorder %s2534_s6, %s2117_s13  ;;  %p2122_p9 = scmp.lt.u32.totalorder %s2534_s6, %s2582_s3 }
0x152f   : > { %p2123_p1 = scmp.lt.u32.totalorder %s2121_s10, %s2117_s13  ;;  %p2125_p6 = scmp.lt.u32.totalorder %s2117_s13, %s2534_s6 }
0x1530   : > { %p2119_p5 = pnand %p2118_p4, %p2590_p11 }
0x1531   : > { %p2124_p3 = por %p2123_p1, %p2122_p9 }
0x1532   : > { %p2120_p7 = pneg %p2119_p5 }
0x1533   : > { %p2126_p12 = por %p2125_p6, %p2124_p3 }
0x1535   : > { %p2127_p13 = pnand %p2126_p12, %p2120_p7 }
0x1537   : > { %2130 = shalt.err (!%p2127_p13)
}
0x1538   : > { %1993 = dma.vmem_to_hbm [thread:$0]  (%p2590_p11), %s1676_s29, 64, %s2534_s6, %s1657_s7  }
0x1539   : > { %p224_p8 = scmp.lt.s32.totalorder %s2223_s19, 1 }
0x153b   : > { %s2598_s19 = smov (!%p224_p8, %s2223_s19), 1 }
0x153c   : > { %s1822_s23 = sshll.u32 %s2598_s19, 4 }
0x153d   : > { %s228_s5 = scalar_lea.vmem %s2583_s4, %s1822_s23 }
0x15b6   : > { %v1645_v9 = vpop.xlane.xlu1 %1644 }
0x15b7   : > { %2069 = vrcp.f32 %v1645_v9 }
0x15b8   : > { %v1648_v10 = vpop.xlane.xlu0 %1647 }
0x15b9   : > { %2071 = vrcp.f32 %v1648_v10 }
0x15c1   : > { %v2070_v11 = vpop.eup %2069 }
0x15c2   : > { %v1650_v12 = vmul.f32 %v2070_v11, %v2066_v5 }
0x15c3   : > { %v2072_v13 = vpop.eup %2071 }
0x15c4   : > { %1654 = vst.msk [vmem:[%s228_s5] sm:$0xff] %vm1630_vm3, %v1650_v12  ;;  %v1652_v15 = vmul.f32 %v2072_v13, %v2068_v7 }
0x15c6   : > { %1655 = vst.msk [vmem:[%s228_s5 + $0x8] sm:$0xff] %vm1630_vm3, %v1652_v15 }
0x15c7 PF: > { %s1690_s27 = sand.u32 1, %s2157_s15   ;;  %p2591_p11 = scmp.ne.s32.totalorder %s2588_s28, 0 }
0x15c8   : > { %p2592_p10 = scmp.ge.s32.totalorder %s2169_s18, 2  ;;  %s1691_s19 = scalar_lea.sflag [#allocation4], %s1690_s27 }
0x15ca   : > { %p2000_p0 = pnand %p2592_p10, %p2591_p11 }
0x15cc   : > { %2152 = dma.done.wait (!%p2000_p0), %s1691_s19, 64  }
0x15cd   : > { %2154 = vsyncadd (!%p2000_p0), %s1691_s19, 4294967232  ;;  %p18_p2 = scmp.ge.s32.totalorder %s2227_s21, 4   ;;  %s2593_s15 = smov %s2161_s16 }
0x15ce   : > { %s2594_s16 = smov %s2165_s17  ;;  %s2595_s17 = smov %s2239_s24 }
0x15cf   : > { %s2596_s18 = smov %s2227_s21  ;;  %20 = sbr.rel (!%p18_p2) target bundleno = 5 (0x5), region = 89 }
0x15d6   :  { %1704 = vsyncpa [#allocation3], 1 }
0x15d7   :  { %1706 = vsyncpa [#allocation3 + $0x1], 1 }
0x15d8   :  { %1707 = vsyncpa [#allocation4], 1 }
0x15d9   :  { %1709 = vsyncpa [#allocation4 + $0x1], 1 }

</bundles_post_ra>
